<compile_context>
chip_gen: v7x
topology: tpu7x:2x2x1
jax: 0.10.0
libtpu: 0.0.40
codegen_flags: <defaults>
</compile_context>

<pallas_src>
import functools
from typing import NamedTuple, Sequence, Tuple

import jax
import jax.numpy as jnp
from jax.experimental import pallas as pl
from jax.experimental.pallas import tpu as pltpu

LANE = 128  # TPU lane width; all padded feature slabs use this many lanes.

# SELU constants (match torch.nn.functional.selu).
_SELU_ALPHA = 1.6732632423543772848170429916717
_SELU_SCALE = 1.0507009873554804934193349852946


def _selu(x):
    # Clamp the exp argument: for x > 0 that branch is discarded anyway, and
    # clamping avoids inf from exp(large) in the masked-out arm.
    neg = _SELU_ALPHA * (jnp.exp(jnp.minimum(x, 0.0)) - 1.0)
    return _SELU_SCALE * jnp.where(x > 0, x, neg)


def _mlp_kernel(x_ref, w1_ref, w2_ref, w3_ref, w4_ref, b_ref, o_ref,
                *, apply_tanh):
    """Fused N-network, 4-layer MLP forward for one batch tile.

    x_ref : [tile_b, obs_dim]         f32
    wL_ref: [num_nets, K_L, 128]      bf16 (zero padded, resident in VMEM)
    b_ref : [num_nets * 4, 128]       f32  (zero padded)
    o_ref : [tile_b, num_nets * 128]  f32  (lane-dense padded outputs)
    """
    num_nets = len(apply_tanh)
    x = x_ref[...].astype(jnp.bfloat16)
    w_refs = (w1_ref, w2_ref, w3_ref, w4_ref)

    for n in range(num_nets):
        h = x
        for l in range(4):
            w = w_refs[l][n]                    # [K_L, 128] bf16 (static idx)
            row = n * 4 + l
            b = b_ref[row:row + 1, :]           # [1, 128] f32
            acc = jnp.dot(h, w, preferred_element_type=jnp.float32) + b
            if l < 3:
                h = _selu(acc).astype(jnp.bfloat16)
            elif apply_tanh[n]:
                h = jnp.tanh(acc)
            else:
                h = acc
        o_ref[:, n * LANE:(n + 1) * LANE] = h.astype(o_ref.dtype)


class PackedNet(NamedTuple):
    weights: Tuple[jnp.ndarray, ...]   # 4 x [K_L, 128] bf16
    biases: jnp.ndarray                # [4, 128] f32
    obs_dim: int
    act_dim: int
    layer_dims: Tuple[Tuple[int, int], ...]


def pack_network(params) -> PackedNet:
    """Pad a raw parameter dict (w1..w4 [in,out], b1..b4 [1,out]) into
    lane-aligned bf16 weight slabs and one f32 bias slab."""
    dims = tuple(params[f"w{l}"].shape for l in range(1, 5))
    obs_dim = dims[0][0]
    act_dim = dims[3][1]
    for l, (k, n_out) in enumerate(dims):
        assert n_out <= LANE, "feature dims must be <= 128 for this packing"
        if l > 0:
            assert k <= LANE

    weights = []
    for l, (k, n_out) in enumerate(dims):
        kpad = obs_dim if l == 0 else LANE
        w = jnp.zeros((kpad, LANE), jnp.float32)
        w = w.at[:k, :n_out].set(params[f"w{l + 1}"])
        weights.append(w.astype(jnp.bfloat16))

    biases = jnp.zeros((4, LANE), jnp.float32)
    for l, (_, n_out) in enumerate(dims):
        biases = biases.at[l, :n_out].set(params[f"b{l + 1}"].reshape(-1))

    return PackedNet(tuple(weights), biases, obs_dim, act_dim, dims)


def _pick_tile_b(batch, tile_b):
    if tile_b is not None:
        assert batch % tile_b == 0
        assert tile_b == batch or tile_b % 8 == 0
        return tile_b
    # Prefer large, 8-aligned tiles that still give grid >= 2 so the BlockSpec
    # pipeline double-buffers and megacore parts can use both TensorCores.
    for cand in (1024, 512, 256, 128, 64, 32, 16, 8):
        if batch % cand == 0 and batch // cand >= 2:
            return cand
    return batch


def _cost_estimate(batch, nets, apply_tanh, obs_bytes, param_bytes, out_bytes):
    flops = 0
    trans = 0
    for net, tanh_flag in zip(nets, apply_tanh):
        flops += batch * sum(2 * k * n for (k, n) in net.layer_dims)
        trans += batch * sum(n for (_, n) in net.layer_dims[:3])  # SELU exps
        if tanh_flag:
            trans += batch * net.layer_dims[3][1]
    return pl.CostEstimate(flops=int(flops), transcendentals=int(trans),
                           bytes_accessed=int(obs_bytes + param_bytes +
                                              out_bytes))


def _run_packed(obs, nets: Sequence[PackedNet], apply_tanh, tile_b=None):
    batch, obs_dim = obs.shape
    num = len(nets)
    for net in nets:
        assert net.obs_dim == obs_dim

    tile_b = _pick_tile_b(batch, tile_b)
    grid = (batch // tile_b,)
    out_lanes = num * LANE

    # Stack per-network slabs: w_stacks[l] is [num, K_L, 128] bf16,
    # b_stack is [num * 4, 128] f32.
    w_stacks = [jnp.stack([net.weights[l] for net in nets], axis=0)
                for l in range(4)]
    b_stack = jnp.concatenate([net.biases for net in nets], axis=0)

    in_specs = [pl.BlockSpec((tile_b, obs_dim), lambda i: (i, 0))]
    for w in w_stacks:
        # Constant block index -> weights stay resident in VMEM across steps.
        in_specs.append(pl.BlockSpec(w.shape, lambda i: (0, 0, 0)))
    in_specs.append(pl.BlockSpec(b_stack.shape, lambda i: (0, 0)))

    out_spec = pl.BlockSpec((tile_b, out_lanes), lambda i: (i, 0))

    kernel = functools.partial(_mlp_kernel, apply_tanh=tuple(apply_tanh))

    param_bytes = (sum(int(w.size) * w.dtype.itemsize for w in w_stacks)
                   + int(b_stack.size) * b_stack.dtype.itemsize)
    cost = _cost_estimate(batch, nets, apply_tanh,
                          obs_bytes=int(obs.size) * obs.dtype.itemsize,
                          param_bytes=param_bytes,
                          out_bytes=batch * out_lanes * 4)

    return pl.pallas_call(
        kernel,
        out_shape=jax.ShapeDtypeStruct((batch, out_lanes), jnp.float32),
        grid_spec=pltpu.PrefetchScalarGridSpec(
            num_scalar_prefetch=0,
            grid=grid,
            in_specs=in_specs,
            out_specs=out_spec,
        ),
        compiler_params=pltpu.CompilerParams(
            dimension_semantics=("parallel",)),
        cost_estimate=cost,
    )(obs, *w_stacks, b_stack)


def actor_critic_forward(name, obs, packed: PackedNet, *, tile_b=None):
    """Forward pass of a single ActorCritic network (matches the module)."""
    assert name in ("actor", "critic")
    out = _run_packed(obs, [packed], apply_tanh=(name == "actor",),
                      tile_b=tile_b)
    return out[:, :packed.act_dim]


def fused_actor_critic_forward(obs, actor: PackedNet, critic: PackedNet, *,
                               tile_b=None):
    """Evaluate actor and critic in one kernel, sharing the obs read."""
    out = _run_packed(obs, [actor, critic], apply_tanh=(True, False),
                      tile_b=tile_b)
    return out[:, :actor.act_dim], out[:, LANE:LANE + critic.act_dim]


def init_params(key, obs_dim, hid1_dim, hid2_dim, hid3_dim, act_dim):
    """Deterministic init mimicking nn.Linear default U(-1/sqrt(fan_in), .)."""
    dims = [(obs_dim, hid1_dim), (hid1_dim, hid2_dim),
            (hid2_dim, hid3_dim), (hid3_dim, act_dim)]
    params = {}
    for idx, (fan_in, fan_out) in enumerate(dims, start=1):
        key, kw, kb = jax.random.split(key, 3)
        bound = 1.0 / (fan_in ** 0.5)
        params[f"w{idx}"] = jax.random.uniform(
            kw, (fan_in, fan_out), jnp.float32, -bound, bound)
        params[f"b{idx}"] = jax.random.uniform(
            kb, (1, fan_out), jnp.float32, -bound, bound)
    return params


def _reference_forward(name, obs, params, *, matmul_dtype=jnp.float32):
    def mm(h, w):
        return jnp.dot(h.astype(matmul_dtype), w.astype(matmul_dtype),
                       preferred_element_type=jnp.float32)
    h = _selu(mm(obs, params["w1"]) + params["b1"])
    h = _selu(mm(h, params["w2"]) + params["b2"])
    h = _selu(mm(h, params["w3"]) + params["b3"])
    out = mm(h, params["w4"]) + params["b4"]
    if name == "actor":
        out = jnp.tanh(out)
    return out


if __name__ == "__main__":
    # Small, module-consistent shapes; batch chosen so the kernel actually
    # tiles (tile_b auto-picks 256 -> grid=(2,)).
    batch = 512
    obs_dim, hid1_dim, hid2_dim, hid3_dim, act_dim = 16, 32, 32, 32, 8

    key = jax.random.PRNGKey(0)
    key, kobs, kactor, kcritic = jax.random.split(key, 4)
    obs = jax.random.normal(kobs, (batch, obs_dim), jnp.float32)

    actor_raw = init_params(kactor, obs_dim, hid1_dim, hid2_dim, hid3_dim,
                            act_dim)
    critic_raw = init_params(kcritic, obs_dim, hid1_dim, hid2_dim, hid3_dim, 1)

    actor_packed = pack_network(actor_raw)
    critic_packed = pack_network(critic_raw)

    # Single-network forward (module semantics: 'actor' -> tanh, 'critic' -> id).
    actor_out = actor_critic_forward("actor", obs, actor_packed)
    critic_out = actor_critic_forward("critic", obs, critic_packed)

    # Fused actor+critic forward (obs read once, one kernel launch).
    actor_out_f, critic_out_f = fused_actor_critic_forward(
        obs, actor_packed, critic_packed)

    jax.block_until_ready((actor_out, critic_out, actor_out_f, critic_out_f))

    # Tight check vs a reference that uses the same bf16 matmul operands.
    ref_actor_bf16 = _reference_forward("actor", obs, actor_raw,
                                        matmul_dtype=jnp.bfloat16)
    ref_critic_bf16 = _reference_forward("critic", obs, critic_raw,
                                         matmul_dtype=jnp.bfloat16)
    assert jnp.allclose(actor_out, ref_actor_bf16, atol=1e-3, rtol=1e-3)
    assert jnp.allclose(critic_out, ref_critic_bf16, atol=1e-3, rtol=1e-3)
    assert jnp.allclose(actor_out_f, ref_actor_bf16, atol=1e-3, rtol=1e-3)
    assert jnp.allclose(critic_out_f, ref_critic_bf16, atol=1e-3, rtol=1e-3)

    # Loose check vs the pure-f32 PyTorch-semantics reference (the only
    # intentional deviation is bf16 MXU operands).
    ref_actor_f32 = _reference_forward("actor", obs, actor_raw)
    ref_critic_f32 = _reference_forward("critic", obs, critic_raw)
    assert jnp.allclose(actor_out, ref_actor_f32, atol=1e-1, rtol=1e-1)
    assert jnp.allclose(critic_out, ref_critic_f32, atol=1e-1, rtol=1e-1)

    print("KERNEL_OK")
</pallas_src>

<mosaic_0001>
module attributes {stable_mosaic.version = 11 : i64} {
  func.func @_mlp_kernel(%arg0: i32, %arg1: memref<256x16xf32, #tpu.memory_space<vmem>>, %arg2: memref<1x16x128xbf16, #tpu.memory_space<vmem>>, %arg3: memref<1x128x128xbf16, #tpu.memory_space<vmem>>, %arg4: memref<1x128x128xbf16, #tpu.memory_space<vmem>>, %arg5: memref<1x128x128xbf16, #tpu.memory_space<vmem>>, %arg6: memref<4x128xf32, #tpu.memory_space<vmem>>, %arg7: memref<256x128xf32, #tpu.memory_space<vmem>>) attributes {dimension_semantics = [#tpu.dimension_semantics<parallel>], iteration_bounds = array<i64: 2>, scalar_prefetch = 0 : i64, scratch_operands = 0 : i64, tpu.core_type = #tpu.core_type<tc>, window_params = [{transform_indices = @transform_0, window_bounds = array<i64: 256, 16>}, {pipeline_mode = #tpu.pipeline_mode<synchronous>, transform_indices = @transform_1, window_bounds = array<i64: 1, 16, 128>}, {pipeline_mode = #tpu.pipeline_mode<synchronous>, transform_indices = @transform_2, window_bounds = array<i64: 1, 128, 128>}, {pipeline_mode = #tpu.pipeline_mode<synchronous>, transform_indices = @transform_3, window_bounds = array<i64: 1, 128, 128>}, {pipeline_mode = #tpu.pipeline_mode<synchronous>, transform_indices = @transform_4, window_bounds = array<i64: 1, 128, 128>}, {pipeline_mode = #tpu.pipeline_mode<synchronous>, transform_indices = @transform_5, window_bounds = array<i64: 4, 128>}, {transform_indices = @transform_6, window_bounds = array<i64: 256, 128>}]} {
    %c0 = arith.constant 0 : index
    %c0_0 = arith.constant 0 : index
    %0 = vector.load %arg1[%c0, %c0_0] : memref<256x16xf32, #tpu.memory_space<vmem>>, vector<256x16xf32>
    %1 = arith.truncf %0 : vector<256x16xf32> to vector<256x16xbf16>
    %c0_1 = arith.constant 0 : index
    %c0_2 = arith.constant 0 : index
    %c0_3 = arith.constant 0 : index
    %2 = vector.load %arg2[%c0_1, %c0_2, %c0_3] : memref<1x16x128xbf16, #tpu.memory_space<vmem>>, vector<1x16x128xbf16>
    %3 = vector.shape_cast %2 : vector<1x16x128xbf16> to vector<16x128xbf16>
    %c0_4 = arith.constant 0 : index
    %c0_5 = arith.constant 0 : index
    %4 = vector.load %arg6[%c0_4, %c0_5] : memref<4x128xf32, #tpu.memory_space<vmem>>, vector<1x128xf32>
    %cst = arith.constant dense<0.000000e+00> : vector<256x128xf32>
    %5 = tpu.matmul %1, %3, %cst {dimension_numbers = #tpu.dot_dimension_numbers<[1], [0], [0], [1], [0, 0, 1, 1], [], []>} : vector<256x16xbf16>, vector<16x128xbf16>, vector<256x128xf32> -> vector<256x128xf32>
    %6 = vector.broadcast %4 : vector<1x128xf32> to vector<256x128xf32>
    %7 = arith.addf %5, %6 : vector<256x128xf32>
    %cst_6 = arith.constant 0.000000e+00 : f32
    %8 = vector.broadcast %cst_6 : f32 to vector<256x128xf32>
    %9 = arith.minimumf %7, %8 : vector<256x128xf32>
    %10 = math.exp %9 : vector<256x128xf32>
    %cst_7 = arith.constant 1.000000e+00 : f32
    %11 = vector.broadcast %cst_7 : f32 to vector<256x128xf32>
    %12 = arith.subf %10, %11 : vector<256x128xf32>
    %cst_8 = arith.constant 1.67326319 : f32
    %13 = vector.broadcast %cst_8 : f32 to vector<256x128xf32>
    %14 = arith.mulf %13, %12 : vector<256x128xf32>
    %cst_9 = arith.constant 0.000000e+00 : f32
    %15 = vector.broadcast %cst_9 : f32 to vector<256x128xf32>
    %16 = arith.cmpf ogt, %7, %15 : vector<256x128xf32>
    %17 = arith.select %16, %7, %14 : vector<256x128xi1>, vector<256x128xf32>
    %cst_10 = arith.constant 1.05070102 : f32
    %18 = vector.broadcast %cst_10 : f32 to vector<256x128xf32>
    %19 = arith.mulf %18, %17 : vector<256x128xf32>
    %20 = arith.truncf %19 : vector<256x128xf32> to vector<256x128xbf16>
    %c0_11 = arith.constant 0 : index
    %c0_12 = arith.constant 0 : index
    %c0_13 = arith.constant 0 : index
    %21 = vector.load %arg3[%c0_11, %c0_12, %c0_13] : memref<1x128x128xbf16, #tpu.memory_space<vmem>>, vector<1x128x128xbf16>
    %22 = vector.shape_cast %21 : vector<1x128x128xbf16> to vector<128x128xbf16>
    %c1 = arith.constant 1 : index
    %c0_14 = arith.constant 0 : index
    %23 = vector.load %arg6[%c1, %c0_14] : memref<4x128xf32, #tpu.memory_space<vmem>>, vector<1x128xf32>
    %cst_15 = arith.constant dense<0.000000e+00> : vector<256x128xf32>
    %24 = tpu.matmul %20, %22, %cst_15 {dimension_numbers = #tpu.dot_dimension_numbers<[1], [0], [0], [1], [0, 0, 1, 1], [], []>} : vector<256x128xbf16>, vector<128x128xbf16>, vector<256x128xf32> -> vector<256x128xf32>
    %25 = vector.broadcast %23 : vector<1x128xf32> to vector<256x128xf32>
    %26 = arith.addf %24, %25 : vector<256x128xf32>
    %cst_16 = arith.constant 0.000000e+00 : f32
    %27 = vector.broadcast %cst_16 : f32 to vector<256x128xf32>
    %28 = arith.minimumf %26, %27 : vector<256x128xf32>
    %29 = math.exp %28 : vector<256x128xf32>
    %cst_17 = arith.constant 1.000000e+00 : f32
    %30 = vector.broadcast %cst_17 : f32 to vector<256x128xf32>
    %31 = arith.subf %29, %30 : vector<256x128xf32>
    %cst_18 = arith.constant 1.67326319 : f32
    %32 = vector.broadcast %cst_18 : f32 to vector<256x128xf32>
    %33 = arith.mulf %32, %31 : vector<256x128xf32>
    %cst_19 = arith.constant 0.000000e+00 : f32
    %34 = vector.broadcast %cst_19 : f32 to vector<256x128xf32>
    %35 = arith.cmpf ogt, %26, %34 : vector<256x128xf32>
    %36 = arith.select %35, %26, %33 : vector<256x128xi1>, vector<256x128xf32>
    %cst_20 = arith.constant 1.05070102 : f32
    %37 = vector.broadcast %cst_20 : f32 to vector<256x128xf32>
    %38 = arith.mulf %37, %36 : vector<256x128xf32>
    %39 = arith.truncf %38 : vector<256x128xf32> to vector<256x128xbf16>
    %c0_21 = arith.constant 0 : index
    %c0_22 = arith.constant 0 : index
    %c0_23 = arith.constant 0 : index
    %40 = vector.load %arg4[%c0_21, %c0_22, %c0_23] : memref<1x128x128xbf16, #tpu.memory_space<vmem>>, vector<1x128x128xbf16>
    %41 = vector.shape_cast %40 : vector<1x128x128xbf16> to vector<128x128xbf16>
    %c2 = arith.constant 2 : index
    %c0_24 = arith.constant 0 : index
    %42 = vector.load %arg6[%c2, %c0_24] : memref<4x128xf32, #tpu.memory_space<vmem>>, vector<1x128xf32>
    %cst_25 = arith.constant dense<0.000000e+00> : vector<256x128xf32>
    %43 = tpu.matmul %39, %41, %cst_25 {dimension_numbers = #tpu.dot_dimension_numbers<[1], [0], [0], [1], [0, 0, 1, 1], [], []>} : vector<256x128xbf16>, vector<128x128xbf16>, vector<256x128xf32> -> vector<256x128xf32>
    %44 = vector.broadcast %42 : vector<1x128xf32> to vector<256x128xf32>
    %45 = arith.addf %43, %44 : vector<256x128xf32>
    %cst_26 = arith.constant 0.000000e+00 : f32
    %46 = vector.broadcast %cst_26 : f32 to vector<256x128xf32>
    %47 = arith.minimumf %45, %46 : vector<256x128xf32>
    %48 = math.exp %47 : vector<256x128xf32>
    %cst_27 = arith.constant 1.000000e+00 : f32
    %49 = vector.broadcast %cst_27 : f32 to vector<256x128xf32>
    %50 = arith.subf %48, %49 : vector<256x128xf32>
    %cst_28 = arith.constant 1.67326319 : f32
    %51 = vector.broadcast %cst_28 : f32 to vector<256x128xf32>
    %52 = arith.mulf %51, %50 : vector<256x128xf32>
    %cst_29 = arith.constant 0.000000e+00 : f32
    %53 = vector.broadcast %cst_29 : f32 to vector<256x128xf32>
    %54 = arith.cmpf ogt, %45, %53 : vector<256x128xf32>
    %55 = arith.select %54, %45, %52 : vector<256x128xi1>, vector<256x128xf32>
    %cst_30 = arith.constant 1.05070102 : f32
    %56 = vector.broadcast %cst_30 : f32 to vector<256x128xf32>
    %57 = arith.mulf %56, %55 : vector<256x128xf32>
    %58 = arith.truncf %57 : vector<256x128xf32> to vector<256x128xbf16>
    %c0_31 = arith.constant 0 : index
    %c0_32 = arith.constant 0 : index
    %c0_33 = arith.constant 0 : index
    %59 = vector.load %arg5[%c0_31, %c0_32, %c0_33] : memref<1x128x128xbf16, #tpu.memory_space<vmem>>, vector<1x128x128xbf16>
    %60 = vector.shape_cast %59 : vector<1x128x128xbf16> to vector<128x128xbf16>
    %c3 = arith.constant 3 : index
    %c0_34 = arith.constant 0 : index
    %61 = vector.load %arg6[%c3, %c0_34] : memref<4x128xf32, #tpu.memory_space<vmem>>, vector<1x128xf32>
    %cst_35 = arith.constant dense<0.000000e+00> : vector<256x128xf32>
    %62 = tpu.matmul %58, %60, %cst_35 {dimension_numbers = #tpu.dot_dimension_numbers<[1], [0], [0], [1], [0, 0, 1, 1], [], []>} : vector<256x128xbf16>, vector<128x128xbf16>, vector<256x128xf32> -> vector<256x128xf32>
    %63 = vector.broadcast %61 : vector<1x128xf32> to vector<256x128xf32>
    %64 = arith.addf %62, %63 : vector<256x128xf32>
    %65 = math.tanh %64 : vector<256x128xf32>
    %c0_36 = arith.constant 0 : index
    %c0_37 = arith.constant 0 : index
    %66 = vector.load %arg7[%c0_36, %c0_37] : memref<256x128xf32, #tpu.memory_space<vmem>>, vector<256x128xf32>
    tpu.vector_store %arg7[%c0_36, %c0_37], %65 {strides = array<i32>} : memref<256x128xf32, #tpu.memory_space<vmem>>, vector<256x128xf32>,
    return
  }
  func.func @transform_0(%arg0: i32) -> (i32, i32) {
    %c0_i32 = arith.constant 0 : i32
    %c0_i32_0 = arith.constant 0 : i32
    return %arg0, %c0_i32 : i32, i32
  }
  func.func @transform_1(%arg0: i32) -> (i32, i32, i32) {
    %c0_i32 = arith.constant 0 : i32
    %c0_i32_0 = arith.constant 0 : i32
    %c0_i32_1 = arith.constant 0 : i32
    %c0_i32_2 = arith.constant 0 : i32
    return %c0_i32, %c0_i32_0, %c0_i32_1 : i32, i32, i32
  }
  func.func @transform_2(%arg0: i32) -> (i32, i32, i32) {
    %c0_i32 = arith.constant 0 : i32
    %c0_i32_0 = arith.constant 0 : i32
    %c0_i32_1 = arith.constant 0 : i32
    %c0_i32_2 = arith.constant 0 : i32
    return %c0_i32, %c0_i32_0, %c0_i32_1 : i32, i32, i32
  }
  func.func @transform_3(%arg0: i32) -> (i32, i32, i32) {
    %c0_i32 = arith.constant 0 : i32
    %c0_i32_0 = arith.constant 0 : i32
    %c0_i32_1 = arith.constant 0 : i32
    %c0_i32_2 = arith.constant 0 : i32
    return %c0_i32, %c0_i32_0, %c0_i32_1 : i32, i32, i32
  }
  func.func @transform_4(%arg0: i32) -> (i32, i32, i32) {
    %c0_i32 = arith.constant 0 : i32
    %c0_i32_0 = arith.constant 0 : i32
    %c0_i32_1 = arith.constant 0 : i32
    %c0_i32_2 = arith.constant 0 : i32
    return %c0_i32, %c0_i32_0, %c0_i32_1 : i32, i32, i32
  }
  func.func @transform_5(%arg0: i32) -> (i32, i32) {
    %c0_i32 = arith.constant 0 : i32
    %c0_i32_0 = arith.constant 0 : i32
    %c0_i32_1 = arith.constant 0 : i32
    return %c0_i32, %c0_i32_0 : i32, i32
  }
  func.func @transform_6(%arg0: i32) -> (i32, i32) {
    %c0_i32 = arith.constant 0 : i32
    %c0_i32_0 = arith.constant 0 : i32
    return %arg0, %c0_i32 : i32, i32
  }
}

</mosaic_0001>

<bundles_post_ra>
// kernel: tpu_custom_call.1
= control target key start
LH: loop header
LB: loop body
LE: loop exit
PB: predicated region body
PF: predicated region fallthrough
CT: control target
= control target key end

     0   :  { %11 = vsyncpa [#allocation3], 0  ;;  %s4070_s0 = inlined_call_operand.vmem [shape: f32[512,16], index: 0, kind: input, shape index: {}]   ;;  %s4071_s1 = inlined_call_operand.vmem [shape: bf16[1,16,128], index: 1, kind: input, shape index: {}]   ;;  %s4072_s2 = inlined_call_operand.vmem [shape: bf16[1,128,128], index: 2, kind: input, shape index: {}]   ;;  %s4073_s3 = inlined_call_operand.vmem [shape: bf16[1,128,128], index: 3, kind: input, shape index: {}]   ;;  %s4074_s4 = inlined_call_operand.vmem [shape: bf16[1,128,128], index: 4, kind: input, shape index: {}]   ;;  %s4075_s5 = inlined_call_operand.vmem [shape: f32[4,128], index: 5, kind: input, shape index: {}]   ;;  %s4076_s6 = inlined_call_operand.hbm [shape: f32[512,128], index: 6, kind: output, shape index: {}]  }
   0x1   :  { %13 = vsyncpa [#allocation3 + $0x1], 0  ;;  %s3032_s21 = smov 0   ;;  %s3034_s22 = smov 0  }
   0x2   :  { %s3036_s23 = smov 0   ;;  %s3038_s24 = smov 0  }
   0x3 LB: > { %s3053_s25 = sadd.s32 4294967295, %s2992_s24   ;;  %s2171_s26 = sadd.s32 4294967294, %s2992_s24   ;;  %s2992_s24 = sphi %s3038_s24, %s4082_s24   ;;  %s2988_s23 = sphi %s3036_s23, %s4081_s23   ;;  %s2984_s22 = sphi %s3034_s22, %s4080_s22   ;;  %s2980_s21 = sphi %s3032_s21, %s4079_s21  }
   0x4   : > { %s3057_s27 = sadd.s32 1, %s2992_s24   ;;  %s157_s28 = sadd.s32 1, %s2988_s23 }
   0x5   : > { %s154_s29 = ssub.s32 %s2992_s24, %s3057_s27  ;;  %p167_p0 = scmp.ne.s32.totalorder %s2988_s23, %s2984_s22 }
   0x6   : > { %p155_p1 = scmp.eq.s32.totalorder %s154_s29, 0  ;;  %p168_p2 = scmp.eq.s32.totalorder %s3053_s25, 1 }
   0x7   : > { %p173_p3 = scmp.ne.s32.totalorder %s2984_s22, %s2980_s21  ;;  %p174_p4 = scmp.eq.s32.totalorder %s2171_s26, 1 }
   0x8   : > { %s3068_s30 = scalar_select %p155_p1, %s2988_s23, %s157_s28  }
   0x9   : > { %p3070_p5 = por %p168_p2, %p167_p0  ;;  %p3074_p6 = por %p174_p4, %p173_p3 }
   0xa   : > { %p2174_p7 = scmp.ge.s32.totalorder %s2992_s24, 1  ;;  %p216_p8 = scmp.lt.s32.totalorder %s2992_s24, 3 }
   0xc   : > { %p217_p9 = pnand %p2174_p7, %p216_p8 }
   0xd   : > { %v2649_v0 = vld [vmem:[%s4071_s1] sm:$0xff] (!%p217_p9)   ;;  %s2176_s11 = sshll.u32 (!%p217_p9), %s3053_s25, 5  ;;  %vm315_vm0 = vcmask (!%p217_p9), 130048   ;;  %v2651_v50 = vld [vmem:[%s4072_s2 + $0x8] sm:$0xff] (!%p217_p9)   ;;  %v2652_v51 = vld [vmem:[%s4072_s2 + $0x10] sm:$0xff] (!%p217_p9)   ;;  %s243_s12 = sand.u32 (!%p217_p9), 1, %s2984_s22  }
   0xe   : > { %220 = sbr.rel (%p217_p9) target bundleno = 1075 (0x433), region = 44  ;;  %p247_p10 = scmp.lt.s32.totalorder (!%p217_p9), %s2176_s11, 63  ;;  %2414 = vmatprep.subr.bf16.mxu0 (!%p217_p9), %v2649_v0  ;;  %v2650_v1 = vld [vmem:[%s4072_s2] sm:$0xff] (!%p217_p9)   ;;  %v2653_v52 = vld [vmem:[%s4072_s2 + $0x18] sm:$0xff] (!%p217_p9)   ;;  %v2655_v54 = vld [vmem:[%s4072_s2 + $0x28] sm:$0xff] (!%p217_p9)  }
   0xf   : > { %2415 = vmatpush3.bf16.msra.mxu0 (!%p217_p9), %v2649_v0  ;;  %2448 = vmatprep.subr.bf16.mxu1 (!%p217_p9), %v2650_v1  ;;  %v2654_v53 = vld [vmem:[%s4072_s2 + $0x20] sm:$0xff] (!%p217_p9)   ;;  %v2656_v55 = vld [vmem:[%s4072_s2 + $0x30] sm:$0xff] (!%p217_p9)   ;;  %v2657_v56 = vld [vmem:[%s4072_s2 + $0x38] sm:$0xff] (!%p217_p9)   ;;  %s2175_s13 = sshll.u32 (!%p217_p9), %s243_s12, 8  ;;  %s2324_s15 = sshll.u32 (!%p217_p9), %s3053_s25, 12 }
  0x10   : > { %2449 = vmatpush3.bf16.msra.mxu1 (!%p217_p9), %v2650_v1  ;;  %v2658_v57 = vld [vmem:[%s4073_s3] sm:$0xff] (!%p217_p9)   ;;  %v2659_v58 = vld [vmem:[%s4073_s3 + $0x8] sm:$0xff] (!%p217_p9)   ;;  %v2660_v59 = vld [vmem:[%s4073_s3 + $0x10] sm:$0xff] (!%p217_p9)   ;;  %s4020_s19 = scalar_lea.hbm (!%p217_p9), %s4076_s6, %s2324_s15  ;;  %s4029_s25 = scalar_lea.sflag (!%p217_p9), [#allocation3], %s243_s12 }
  0x11   : > { %2450 = vmatprep.subr.bf16.mxu1 (!%p217_p9), %v2651_v50  ;;  %2496 = vmatprep.subr.bf16.mxu0 (!%p217_p9), %v2658_v57  ;;  %v2661_v60 = vld [vmem:[%s4073_s3 + $0x18] sm:$0xff] (!%p217_p9)   ;;  %v2662_v61 = vld [vmem:[%s4073_s3 + $0x20] sm:$0xff] (!%p217_p9)   ;;  %s2994_s26 = smov (!%p217_p9), [#allocation2]  }
  0x12   : > { %v3179_v62 = vld [vmem:[%s4075_s5] ss:$0 sm:$0xff] (!%p217_p9)  ;;  %s2934_s28 = sshll.u32 (!%p217_p9), %s2994_s26, 4  ;;  %s2935_s28 = int_to_ptr.vmem [resolvable:$false] %s2934_s28 }
  0x13   : > { %s2936_s29 = scalar_lea.vmem (!%p217_p9), %s2935_s28, 8192 }
  0x14   : > { %2451 = vmatpush3.bf16.msra.mxu1 (!%p217_p9), %v2651_v50 }
  0x15   : > { %s4084_s11 = smov (!%p247_p10, %s2176_s11), 63  ;;  %2452 = vmatprep.subr.bf16.mxu1 %v2652_v51 }
  0x16   : > { %s2177_s14 = sshll.u32 %s4084_s11, 3 }
  0x17   : > { %s3090_s17 = scalar_lea.vmem %s4070_s0, %s2177_s14  ;;  %s3959_s14 = scalar_lea.vmem [#allocation2], %s2175_s13 }
  0x18   : > { %v254_v2 = vld [vmem:[%s3090_s17] sm:$0xff]  ;;  %v255_v3 = vld [vmem:[%s3090_s17 + $0x8] sm:$0xff]  ;;  %v256_v4 = vld [vmem:[%s3090_s17 + $0x10] sm:$0xff]  ;;  %2453 = vmatpush3.bf16.msra.mxu1 %v2652_v51  ;;  %s2109_s16 = sshll.u32 %s3959_s14, 4  ;;  %s4022_s16 = int_to_ptr.vmem [resolvable:$true] %s2109_s16 }
  0x19   : > { %v286_v5 = vpack.c.bf16 %v255_v3, %v254_v2  ;;  %v257_v6 = vld [vmem:[%s3090_s17 + $0x18] sm:$0xff]  ;;  %v258_v7 = vld [vmem:[%s3090_s17 + $0x20] sm:$0xff]  ;;  %v259_v8 = vld [vmem:[%s3090_s17 + $0x28] sm:$0xff]  ;;  %2454 = vmatprep.subr.bf16.mxu1 %v2653_v52  ;;  %s2930_s20 = scalar_lea.vmem %s4022_s16, 4096  ;;  %p2937_p0 = scmp.lt.s32.totalorder %s4022_s16, %s2935_s28 }
  0x1a   : > { %v287_v9 = vpack.c.bf16 %v257_v6, %v256_v4  ;;  %v288_v10 = vpack.c.bf16 %v259_v8, %v258_v7  ;;  %v260_v11 = vld [vmem:[%s3090_s17 + $0x30] sm:$0xff]  ;;  %v261_v12 = vld [vmem:[%s3090_s17 + $0x38] sm:$0xff]  ;;  %v262_v13 = vld [vmem:[%s3090_s17 + $0x40] sm:$0xff]  ;;  %p2931_p11 = scmp.ne.s32.totalorder %s4022_s16, %s2930_s20  ;;  %p2938_p1 = scmp.lt.s32.totalorder %s2936_s29, %s2930_s20 }
  0x1b   : > { %2416 = vmatprep.mubr.msk.bf16.mxu0 %vm315_vm0, %v286_v5  ;;  %v263_v14 = vld [vmem:[%s3090_s17 + $0x48] sm:$0xff]  ;;  %v289_v15 = vpack.c.bf16 %v261_v12, %v260_v11  ;;  %v264_v17 = vld [vmem:[%s3090_s17 + $0x50] sm:$0xff]  ;;  %v265_v18 = vld [vmem:[%s3090_s17 + $0x58] sm:$0xff] }
  0x1c   : > { %2417 = vmatmul.mubr.msk.bf16.vlgmr.msra.gmra.mrb[0].mxu0 %vm315_vm0, %v287_v9  ;;  %v290_v16 = vpack.c.bf16 %v263_v14, %v262_v13  ;;  %v266_v19 = vld [vmem:[%s3090_s17 + $0x60] sm:$0xff]  ;;  %v267_v20 = vld [vmem:[%s3090_s17 + $0x68] sm:$0xff]  ;;  %v291_v21 = vpack.c.bf16 %v265_v18, %v264_v17  ;;  %v268_v23 = vld [vmem:[%s3090_s17 + $0x70] sm:$0xff]  ;;  %2455 = vmatpush3.bf16.msra.mxu1 %v2653_v52  ;;  %p2932_p12 = pnand %p2931_p11, %p3070_p5  ;;  %p2939_p2 = por %p2938_p1, %p2937_p0 }
  0x1d   : > { %2420 = vmatprep.mubr.msk.bf16.mxu0 %vm315_vm0, %v288_v10  ;;  %v292_v22 = vpack.c.bf16 %v267_v20, %v266_v19  ;;  %v269_v24 = vld [vmem:[%s3090_s17 + $0x78] sm:$0xff]  ;;  %v270_v25 = vld [vmem:[%s3090_s17 + $0x80] sm:$0xff]  ;;  %v271_v26 = vld [vmem:[%s3090_s17 + $0x88] sm:$0xff]  ;;  %2456 = vmatprep.subr.bf16.mxu1 %v2654_v53 }
  0x1e   : > { %v293_v27 = vpack.c.bf16 %v269_v24, %v268_v23  ;;  %v294_v28 = vpack.c.bf16 %v271_v26, %v270_v25  ;;  %v272_v29 = vld [vmem:[%s3090_s17 + $0x90] sm:$0xff]  ;;  %v273_v30 = vld [vmem:[%s3090_s17 + $0x98] sm:$0xff]  ;;  %v274_v31 = vld [vmem:[%s3090_s17 + $0xa0] sm:$0xff]  ;;  %2497 = vmatpush3.bf16.msra.mxu0 %v2658_v57  ;;  %p2933_p13 = pneg %p2932_p12 }
  0x1f   : > { %v275_v32 = vld [vmem:[%s3090_s17 + $0xa8] sm:$0xff]  ;;  %v295_v33 = vpack.c.bf16 %v273_v30, %v272_v29  ;;  %v276_v35 = vld [vmem:[%s3090_s17 + $0xb0] sm:$0xff]  ;;  %v277_v36 = vld [vmem:[%s3090_s17 + $0xb8] sm:$0xff]  ;;  %2498 = vmatprep.subr.bf16.mxu0 %v2659_v58 }
  0x20   : > { %v296_v34 = vpack.c.bf16 %v275_v32, %v274_v31  ;;  %v278_v37 = vld [vmem:[%s3090_s17 + $0xc0] sm:$0xff]  ;;  %v279_v38 = vld [vmem:[%s3090_s17 + $0xc8] sm:$0xff]  ;;  %v297_v39 = vpack.c.bf16 %v277_v36, %v276_v35  ;;  %v280_v41 = vld [vmem:[%s3090_s17 + $0xd0] sm:$0xff]  ;;  %2457 = vmatpush3.bf16.msra.mxu1 %v2654_v53  ;;  %p2940_p3 = pnand %p2939_p2, %p2933_p13 }
  0x21   : > { %v298_v40 = vpack.c.bf16 %v279_v38, %v278_v37  ;;  %v281_v42 = vld [vmem:[%s3090_s17 + $0xd8] sm:$0xff]  ;;  %v282_v43 = vld [vmem:[%s3090_s17 + $0xe0] sm:$0xff]  ;;  %v283_v44 = vld [vmem:[%s3090_s17 + $0xe8] sm:$0xff]  ;;  %2458 = vmatprep.subr.bf16.mxu1 %v2655_v54 }
  0x22   : > { %v299_v45 = vpack.c.bf16 %v281_v42, %v280_v41  ;;  %v300_v46 = vpack.c.bf16 %v283_v44, %v282_v43  ;;  %v284_v47 = vld [vmem:[%s3090_s17 + $0xf0] sm:$0xff]  ;;  %v285_v48 = vld [vmem:[%s3090_s17 + $0xf8] sm:$0xff]  ;;  %2499 = vmatpush3.bf16.msra.mxu0 %v2659_v58 }
  0x23   : > { %v301_v49 = vpack.c.bf16 %v285_v48, %v284_v47  ;;  %2500 = vmatprep.subr.bf16.mxu0 %v2660_v59 }
  0x24   : > { %2421 = vmatmul.mubr.msk.bf16.gmra.mrb[4].mxu0 %vm315_vm0, %v289_v15  ;;  %2459 = vmatpush3.bf16.msra.mxu1 %v2655_v54 }
  0x25   : > { %2424 = vmatprep.mubr.msk.bf16.mxu0 %vm315_vm0, %v290_v16  ;;  %2460 = vmatprep.subr.bf16.mxu1 %v2656_v55 }
  0x26   : > { %2501 = vmatpush3.bf16.msra.mxu0 %v2660_v59 }
  0x27   : > { %2502 = vmatprep.subr.bf16.mxu0 %v2661_v60 }
  0x28   : > { %2461 = vmatpush3.bf16.msra.mxu1 %v2656_v55 }
  0x29   : > { %2462 = vmatprep.subr.bf16.mxu1 %v2657_v56 }
  0x2a   : > { %2503 = vmatpush3.bf16.msra.mxu0 %v2661_v60 }
  0x2b   : > { %2504 = vmatprep.subr.bf16.mxu0 %v2662_v61 }
  0x2c   : > { %2425 = vmatmul.mubr.msk.bf16.gmra.mrb[8].mxu0 %vm315_vm0, %v291_v21  ;;  %2463 = vmatpush3.bf16.msra.mxu1 %v2657_v56 }
  0x2d   : > { %2428 = vmatprep.mubr.msk.bf16.mxu0 %vm315_vm0, %v292_v22 }
  0x2e   : > { %2505 = vmatpush3.bf16.msra.mxu0 %v2662_v61 }
  0x34   : > { %2429 = vmatmul.mubr.msk.bf16.gmra.mrb[12].mxu0 %vm315_vm0, %v293_v27 }
  0x35   : > { %2432 = vmatprep.mubr.msk.bf16.mxu0 %vm315_vm0, %v294_v28 }
  0x3c   : > { %2433 = vmatmul.mubr.msk.bf16.gmra.mrb[16].mxu0 %vm315_vm0, %v295_v33 }
  0x3d   : > { %2436 = vmatprep.mubr.msk.bf16.mxu0 %vm315_vm0, %v296_v34 }
  0x44   : > { %2437 = vmatmul.mubr.msk.bf16.gmra.mrb[20].mxu0 %vm315_vm0, %v297_v39 }
  0x45   : > { %2440 = vmatprep.mubr.msk.bf16.mxu0 %vm315_vm0, %v298_v40 }
  0x4c   : > { %2441 = vmatmul.mubr.msk.bf16.gmra.mrb[24].mxu0 %vm315_vm0, %v299_v45 }
  0x4d   : > { %2444 = vmatprep.mubr.msk.bf16.mxu0 %vm315_vm0, %v300_v46 }
  0x54   : > { %2445 = vmatmul.mubr.msk.bf16.gmra.mrb[28].mxu0 %vm315_vm0, %v301_v49 }
  0xef   : > { %v2418_v63 = vpop.f32.mrb[0].mxu0 }
  0xf0   : > { %v3182_v0 = vadd.f32 %v2418_v63, %v3179_v62  ;;  %v398_v1 = vpop.f32.mrb[1].mxu0 }
  0xf1   : > { %v3185_v2 = vadd.f32 %v3179_v62, %v398_v1  ;;  %v2419_v3 = vpop.f32.mrb[2].mxu0 }
  0xf2   : > { %v527_v4 = vmin.f32 %v3182_v0, 0.0  ;;  %v3189_v5 = vadd.f32 %v2419_v3, %v3179_v62  ;;  %v401_v6 = vpop.f32.mrb[3].mxu0  ;;  %vm687_vm1 = vcmp.gt.f32.partialorder %v3182_v0, 0.0 }
  0xf3   : > { %v525_v7 = vmin.f32 %v3185_v2, 0.0  ;;  %v3193_v8 = vadd.f32 %v3179_v62, %v401_v6  ;;  %vm685_vm2 = vcmp.gt.f32.partialorder %v3185_v2, 0.0 }
  0xf4   : > { %v561_v9 = vmul.f32 1.442695, %v527_v4  ;;  %v528_v10 = vmin.f32 %v3189_v5, 0.0  ;;  %vm688_vm3 = vcmp.gt.f32.partialorder %v3189_v5, 0.0 }
  0xf5   : > { %v526_v11 = vmin.f32 %v3193_v8, 0.0  ;;  %v557_v13 = vmul.f32 1.442695, %v525_v7  ;;  %vm686_vm4 = vcmp.gt.f32.partialorder %v3193_v8, 0.0 }
  0xf6   : > { %2674 = vpow2.f32 %v561_v9  ;;  %v563_v12 = vmul.f32 1.442695, %v528_v10 }
  0xf7   : > { %v2422_v14 = vpop.f32.mrb[4].mxu0  ;;  %v559_v17 = vmul.f32 1.442695, %v526_v11 }
  0xf8   : > { %2676 = vpow2.f32 %v563_v12  ;;  %v3198_v15 = vadd.f32 %v2422_v14, %v3179_v62  ;;  %v414_v16 = vpop.f32.mrb[5].mxu0 }
  0xf9   : > { %v3201_v18 = vadd.f32 %v3179_v62, %v414_v16  ;;  %v2423_v19 = vpop.f32.mrb[6].mxu0  ;;  %2678 = vpow2.f32 %v557_v13 }
  0xfa   : > { %v531_v20 = vmin.f32 %v3198_v15, 0.0  ;;  %v3205_v21 = vadd.f32 %v2423_v19, %v3179_v62  ;;  %v417_v22 = vpop.f32.mrb[7].mxu0  ;;  %2680 = vpow2.f32 %v559_v17  ;;  %vm691_vm5 = vcmp.gt.f32.partialorder %v3198_v15, 0.0 }
  0xfb   : > { %v529_v23 = vmin.f32 %v3201_v18, 0.0  ;;  %v3209_v24 = vadd.f32 %v3179_v62, %v417_v22  ;;  %vm689_vm6 = vcmp.gt.f32.partialorder %v3201_v18, 0.0 }
  0xfc   : > { %v569_v25 = vmul.f32 1.442695, %v531_v20  ;;  %v532_v26 = vmin.f32 %v3205_v21, 0.0  ;;  %vm692_vm7 = vcmp.gt.f32.partialorder %v3205_v21, 0.0 }
  0xfd   : > { %v565_v27 = vmul.f32 1.442695, %v529_v23  ;;  %v530_v28 = vmin.f32 %v3209_v24, 0.0  ;;  %vm690_vm8 = vcmp.gt.f32.partialorder %v3209_v24, 0.0 }
  0xfe   : > { %2682 = vpow2.f32 %v569_v25  ;;  %v571_v29 = vmul.f32 1.442695, %v532_v26 }
  0xff   : > { %2684 = vpow2.f32 %v565_v27  ;;  %v567_v30 = vmul.f32 1.442695, %v530_v28  ;;  %v2426_v31 = vpop.f32.mrb[8].mxu0 }
 0x100   : > { %v2675_v32 = vpop.eup %2674  ;;  %2686 = vpow2.f32 %v571_v29  ;;  %v3214_v33 = vadd.f32 %v2426_v31, %v3179_v62  ;;  %v430_v34 = vpop.f32.mrb[9].mxu0 }
 0x101   : > { %2688 = vpow2.f32 %v567_v30  ;;  %v3217_v35 = vadd.f32 %v3179_v62, %v430_v34  ;;  %v2427_v36 = vpop.f32.mrb[10].mxu0  ;;  %v2198_v41 = vadd.f32 -1.0, %v2675_v32 }
 0x102   : > { %v2677_v37 = vpop.eup %2676  ;;  %v535_v38 = vmin.f32 %v3214_v33, 0.0  ;;  %v3221_v39 = vadd.f32 %v2427_v36, %v3179_v62  ;;  %v433_v40 = vpop.f32.mrb[11].mxu0  ;;  %vm695_vm11 = vcmp.gt.f32.partialorder %v3214_v33, 0.0 }
 0x103   : > { %v2199_v42 = vadd.f32 -1.0, %v2677_v37  ;;  %v533_v43 = vmin.f32 %v3217_v35, 0.0  ;;  %v3226_v45 = vadd.f32 %v3179_v62, %v433_v40  ;;  %v2679_v46 = vpop.eup %2678  ;;  %v655_v52 = vmul.f32 1.6732632, %v2198_v41 }
 0x104   : > { %v536_v44 = vmin.f32 %v3221_v39, 0.0  ;;  %v577_v47 = vmul.f32 1.442695, %v535_v38  ;;  %v2681_v51 = vpop.eup %2680  ;;  %v2196_v59 = vadd.f32 -1.0, %v2679_v46  ;;  %vm693_vm9 = vcmp.gt.f32.partialorder %v3217_v35, 0.0 }
 0x105   : > { %v573_v48 = vmul.f32 1.442695, %v533_v43  ;;  %v534_v50 = vmin.f32 %v3226_v45, 0.0  ;;  %v656_v53 = vmul.f32 1.6732632, %v2199_v42  ;;  %v2197_v7 = vadd.f32 -1.0, %v2681_v51 }
 0x106   : > { %v579_v49 = vmul.f32 1.442695, %v536_v44  ;;  %v719_v10 = vsel %vm687_vm1, %v3182_v0, %v655_v52  ;;  %v653_v17 = vmul.f32 1.6732632, %v2196_v59  ;;  %vm696_vm10 = vcmp.gt.f32.partialorder %v3221_v39, 0.0 }
 0x107   : > { %2690 = vpow2.f32 %v573_v48  ;;  %v2430_v54 = vpop.f32.mrb[12].mxu0  ;;  %v575_v56 = vmul.f32 1.442695, %v534_v50  ;;  %v720_v11 = vsel %vm688_vm3, %v3189_v5, %v656_v53  ;;  %v654_v5 = vmul.f32 1.6732632, %v2197_v7 }
 0x108   : > { %v2683_v55 = vpop.eup %2682  ;;  %2692 = vpow2.f32 %v579_v49  ;;  %v3232_v57 = vadd.f32 %v2430_v54, %v3179_v62  ;;  %v446_v58 = vpop.f32.mrb[13].mxu0  ;;  %v751_v27 = vmul.f32 1.050701, %v719_v10  ;;  %v752_v28 = vmul.f32 1.050701, %v720_v11 }
 0x109   : > { %v2685_v60 = vpop.eup %2684  ;;  %v2202_v61 = vadd.f32 -1.0, %v2683_v55  ;;  %2694 = vpow2.f32 %v577_v47  ;;  %v3236_v63 = vadd.f32 %v3179_v62, %v446_v58  ;;  %v2431_v1 = vpop.f32.mrb[14].mxu0  ;;  %v717_v30 = vsel %vm685_vm2, %v3185_v2, %v653_v17 }
 0x10a   : > { %v2687_v3 = vpop.eup %2686  ;;  %2696 = vpow2.f32 %v575_v56  ;;  %v539_v4 = vmin.f32 %v3232_v57, 0.0  ;;  %v449_v6 = vpop.f32.mrb[15].mxu0  ;;  %v2200_v13 = vadd.f32 -1.0, %v2685_v60  ;;  %v3247_v16 = vadd.f32 %v2431_v1, %v3179_v62 }
 0x10b   : > { %v2689_v9 = vpop.eup %2688  ;;  %v537_v12 = vmin.f32 %v3236_v63, 0.0  ;;  %v659_v19 = vmul.f32 1.6732632, %v2202_v61  ;;  %v3250_v23 = vadd.f32 %v3179_v62, %v449_v6  ;;  %v2203_v0 = vadd.f32 -1.0, %v2687_v3 }
 0x10c   : > { %v585_v14 = vmul.f32 1.442695, %v539_v4  ;;  %v2201_v20 = vadd.f32 -1.0, %v2689_v9  ;;  %v540_v25 = vmin.f32 %v3247_v16, 0.0  ;;  %v657_v36 = vmul.f32 1.6732632, %v2200_v13 }
 0x10d   : > { %v581_v22 = vmul.f32 1.442695, %v537_v12  ;;  %v538_v29 = vmin.f32 %v3250_v23, 0.0  ;;  %v723_v34 = vsel %vm691_vm5, %v3198_v15, %v659_v19  ;;  %v660_v41 = vmul.f32 1.6732632, %v2203_v0 }
 0x10e   : > { %2698 = vpow2.f32 %v585_v14  ;;  %v658_v37 = vmul.f32 1.6732632, %v2201_v20  ;;  %v587_v38 = vmul.f32 1.442695, %v540_v25  ;;  %v718_v2 = vsel %vm686_vm4, %v3193_v8, %v654_v5 }
 0x10f   : > { %2700 = vpow2.f32 %v581_v22  ;;  %v2434_v26 = vpop.f32.mrb[16].mxu0  ;;  %v583_v43 = vmul.f32 1.442695, %v538_v29  ;;  %v749_v15 = vmul.f32 1.050701, %v717_v30  ;;  %v782_v52 = vpack.c.bf16 %v752_v28, %v751_v27 }
 0x110   : > { %v462_v31 = vpop.f32.mrb[17].mxu0  ;;  %2702 = vpow2.f32 %v587_v38  ;;  %v750_v48 = vmul.f32 1.050701, %v718_v2  ;;  %v3268_v51 = vmul.f32 1.050701, %v723_v34  ;;  %v3271_v53 = vadd.f32 %v2434_v26, %v3179_v62 }
 0x111   : > { %v2691_v32 = vpop.eup %2690  ;;  %v2435_v44 = vpop.f32.mrb[18].mxu0  ;;  %2704 = vpow2.f32 %v583_v43  ;;  %v721_v54 = vsel %vm689_vm6, %v3201_v18, %v657_v36  ;;  %v722_v8 = vsel %vm690_vm8, %v3209_v24, %v658_v37  ;;  %v724_v58 = vsel %vm692_vm7, %v3205_v21, %v660_v41 }
 0x112   : > { %v2693_v40 = vpop.eup %2692  ;;  %v2204_v42 = vadd.f32 -1.0, %v2691_v32  ;;  %v465_v49 = vpop.f32.mrb[19].mxu0  ;;  %v781_v56 = vpack.c.bf16 %v750_v48, %v749_v15  ;;  %v543_v61 = vmin.f32 %v3271_v53, 0.0  ;;  %vm694_vm12 = vcmp.gt.f32.partialorder %v3226_v45, 0.0 }
 0x113   : > { %v2695_v46 = vpop.eup %2694  ;;  %v2207_v47 = vadd.f32 -1.0, %v2693_v40  ;;  %v3286_v18 = vadd.f32 %v3179_v62, %v462_v31  ;;  %v754_v6 = vmul.f32 1.050701, %v722_v8  ;;  %v3289_v9 = vadd.f32 %v2435_v44, %v3179_v62 }
 0x114   : > { %v2697_v50 = vpop.eup %2696  ;;  %v2206_v59 = vadd.f32 -1.0, %v2695_v46  ;;  %v661_v60 = vmul.f32 1.6732632, %v2204_v42  ;;  %2464 = vmatprep.mubr.bf16.mxu1 %v781_v56  ;;  %v593_v7 = vmul.f32 1.442695, %v543_v61  ;;  %v3292_v21 = vadd.f32 %v3179_v62, %v465_v49 }
 0x115   : > { %v2205_v55 = vadd.f32 -1.0, %v2697_v50  ;;  %v664_v1 = vmul.f32 1.6732632, %v2207_v47  ;;  %2465 = vmatmul.mubr.bf16.vlgmr.msra.gmra.mrb[0].mxu1 %v782_v52  ;;  %v753_v12 = vmul.f32 1.050701, %v721_v54  ;;  %vm699_vm13 = vcmp.gt.f32.partialorder %v3232_v57, 0.0 }
 0x116   : > { %v756_v13 = vmul.f32 1.050701, %v724_v58  ;;  %v541_v14 = vmin.f32 %v3286_v18, 0.0  ;;  %v663_v19 = vmul.f32 1.6732632, %v2206_v59  ;;  %v544_v0 = vmin.f32 %v3289_v9, 0.0 }
 0x117   : > { %v662_v3 = vmul.f32 1.6732632, %v2205_v55  ;;  %v2438_v24 = vpop.f32.mrb[20].mxu0  ;;  %v725_v25 = vsel %vm693_vm9, %v3217_v35, %v661_v60  ;;  %v728_v26 = vsel %vm696_vm10, %v3221_v39, %v664_v1  ;;  %v542_v28 = vmin.f32 %v3292_v21, 0.0 }
 0x118   : > { %v2699_v4 = vpop.eup %2698  ;;  %v478_v10 = vpop.f32.mrb[21].mxu0  ;;  %v589_v27 = vmul.f32 1.442695, %v541_v14  ;;  %vm697_vm14 = vcmp.gt.f32.partialorder %v3236_v63, 0.0  ;;  %2706 = vpow2.f32 %v593_v7  ;;  %v783_v30 = vpack.c.bf16 %v754_v6, %v753_v12 }
 0x119   : > { %v2701_v11 = vpop.eup %2700  ;;  %v2439_v17 = vpop.f32.mrb[22].mxu0  ;;  %v726_v20 = vsel %vm694_vm12, %v3226_v45, %v662_v3  ;;  %v2210_v22 = vadd.f32 -1.0, %v2699_v4  ;;  %v595_v45 = vmul.f32 1.442695, %v544_v0  ;;  %v591_v34 = vmul.f32 1.442695, %v542_v28 }
 0x11a   : > { %v481_v5 = vpop.f32.mrb[23].mxu0  ;;  %v2208_v29 = vadd.f32 -1.0, %v2701_v11  ;;  %v2703_v31 = vpop.eup %2702  ;;  %v758_v32 = vmul.f32 1.050701, %v726_v20  ;;  %2708 = vpow2.f32 %v589_v27  ;;  %v784_v36 = vpack.c.bf16 %v756_v13, %v3268_v51  ;;  %2468 = vmatprep.mubr.bf16.mxu1 %v783_v30 }
 0x11b   : > { %v2705_v35 = vpop.eup %2704  ;;  %v727_v39 = vsel %vm695_vm11, %v3214_v33, %v663_v19  ;;  %v757_v37 = vmul.f32 1.050701, %v725_v25  ;;  %v667_v38 = vmul.f32 1.6732632, %v2210_v22  ;;  %2710 = vpow2.f32 %v595_v45 }
 0x11c   : > { %v2211_v40 = vadd.f32 -1.0, %v2703_v31  ;;  %vm700_vm15 = vcmp.gt.f32.partialorder %v3247_v16, 0.0  ;;  %v2209_v41 = vadd.f32 -1.0, %v2705_v35  ;;  %2712 = vpow2.f32 %v591_v34 }
 0x11d   : > { %v3314_v42 = vadd.f32 %v2438_v24, %v3179_v62  ;;  %v760_v2 = vmul.f32 1.050701, %v728_v26  ;;  %v665_v44 = vmul.f32 1.6732632, %v2208_v29  ;;  %2469 = vmatmul.mubr.bf16.gmra.mrb[4].mxu1 %v784_v36  ;;  %v3317_v46 = vadd.f32 %v3179_v62, %v478_v10 }
 0x11e   : > { %v3320_v33 = vadd.f32 %v2439_v17, %v3179_v62  ;;  %v666_v15 = vmul.f32 1.6732632, %v2209_v41  ;;  %v3324_v49 = vadd.f32 %v3179_v62, %v481_v5  ;;  %v785_v50 = vpack.c.bf16 %v758_v32, %v757_v37 }
 0x11f   : > { %v2442_v43 = vpop.f32.mrb[24].mxu0  ;;  %v547_v48 = vmin.f32 %v3314_v42, 0.0  ;;  %v759_v52 = vmul.f32 1.050701, %v727_v39  ;;  %v731_v54 = vsel %vm699_vm13, %v3232_v57, %v667_v38  ;;  %v545_v8 = vmin.f32 %v3317_v46, 0.0 }
 0x120   : > { %v494_v47 = vpop.f32.mrb[25].mxu0  ;;  %v548_v55 = vmin.f32 %v3320_v33, 0.0  ;;  %v668_v58 = vmul.f32 1.6732632, %v2211_v40  ;;  %vm698_vm0 = vcmp.gt.f32.partialorder %v3250_v23, 0.0  ;;  %vm701_vm1 = vcmp.gt.f32.partialorder %v3286_v18, 0.0  ;;  %2472 = vmatprep.mubr.bf16.mxu1 %v785_v50 }
 0x121   : > { %v2443_v51 = vpop.f32.mrb[26].mxu0  ;;  %v601_v59 = vmul.f32 1.442695, %v547_v48  ;;  %v730_v60 = vsel %vm698_vm0, %v3250_v23, %v666_v15  ;;  %v597_v61 = vmul.f32 1.442695, %v545_v8  ;;  %v786_v3 = vpack.c.bf16 %v760_v2, %v759_v52 }
 0x122   : > { %v497_v56 = vpop.f32.mrb[27].mxu0  ;;  %v603_v1 = vmul.f32 1.442695, %v548_v55  ;;  %v3334_v24 = vmul.f32 1.050701, %v731_v54  ;;  %v729_v57 = vsel %vm697_vm14, %v3236_v63, %v665_v44  ;;  %v546_v4 = vmin.f32 %v3324_v49, 0.0  ;;  %v2707_v6 = vpop.eup %2706 }
 0x123   : > { %2714 = vpow2.f32 %v601_v59  ;;  %v3341_v7 = vadd.f32 %v2442_v43, %v3179_v62  ;;  %v3344_v10 = vadd.f32 %v3179_v62, %v494_v47  ;;  %v3347_v23 = vadd.f32 %v2443_v51, %v3179_v62 }
 0x124   : > { %2716 = vpow2.f32 %v597_v61  ;;  %v2709_v11 = vpop.eup %2708  ;;  %v762_v12 = vmul.f32 1.050701, %v730_v60  ;;  %vm702_vm2 = vcmp.gt.f32.partialorder %v3292_v21, 0.0  ;;  %v599_v63 = vmul.f32 1.442695, %v546_v4 }
 0x125   : > { %2718 = vpow2.f32 %v603_v1  ;;  %v2711_v14 = vpop.eup %2710  ;;  %v732_v17 = vsel %vm700_vm15, %v3247_v16, %v668_v58  ;;  %vm703_vm3 = vcmp.gt.f32.partialorder %v3271_v53, 0.0  ;;  %v2212_v19 = vadd.f32 -1.0, %v2709_v11  ;;  %2473 = vmatmul.mubr.bf16.gmra.mrb[8].mxu1 %v786_v3 }
 0x126   : > { %v551_v20 = vmin.f32 %v3341_v7, 0.0  ;;  %v549_v22 = vmin.f32 %v3344_v10, 0.0  ;;  %v2713_v5 = vpop.eup %2712  ;;  %v761_v25 = vmul.f32 1.050701, %v729_v57  ;;  %v2214_v26 = vadd.f32 -1.0, %v2707_v6 }
 0x127   : > { %v2446_v13 = vpop.f32.mrb[28].mxu0  ;;  %vm704_vm4 = vcmp.gt.f32.partialorder %v3289_v9, 0.0  ;;  %2720 = vpow2.f32 %v599_v63  ;;  %v3358_v27 = vadd.f32 %v3179_v62, %v497_v56  ;;  %v669_v16 = vmul.f32 1.6732632, %v2212_v19 }
 0x128   : > { %v510_v0 = vpop.f32.mrb[29].mxu0  ;;  %v2215_v29 = vadd.f32 -1.0, %v2711_v14  ;;  %v2213_v45 = vadd.f32 -1.0, %v2713_v5  ;;  %v552_v30 = vmin.f32 %v3347_v23, 0.0  ;;  %v764_v31 = vmul.f32 1.050701, %v732_v17 }
 0x129   : > { %v2447_v28 = vpop.f32.mrb[30].mxu0  ;;  %vm707_vm5 = vcmp.gt.f32.partialorder %v3314_v42, 0.0  ;;  %v609_v32 = vmul.f32 1.442695, %v551_v20  ;;  %v605_v34 = vmul.f32 1.442695, %v549_v22  ;;  %v787_v36 = vpack.c.bf16 %v762_v12, %v761_v25 }
 0x12a   : > { %v733_v35 = vsel %vm701_vm1, %v3286_v18, %v669_v16  ;;  %v670_v39 = vmul.f32 1.6732632, %v2213_v45  ;;  %vm705_vm6 = vcmp.gt.f32.partialorder %v3317_v46, 0.0  ;;  %v611_v37 = vmul.f32 1.442695, %v552_v30  ;;  %v513_v38 = vpop.f32.mrb[31].mxu0 }
 0x12b   : > { %v671_v40 = vmul.f32 1.6732632, %v2214_v26  ;;  %vm708_vm7 = vcmp.gt.f32.partialorder %v3320_v33, 0.0  ;;  %2722 = vpow2.f32 %v609_v32  ;;  %v550_v41 = vmin.f32 %v3358_v27, 0.0  ;;  %2476 = vmatprep.mubr.bf16.mxu1 %v787_v36 }
 0x12c   : > { %v765_v43 = vmul.f32 1.050701, %v733_v35  ;;  %v672_v2 = vmul.f32 1.6732632, %v2215_v29  ;;  %v734_v44 = vsel %vm702_vm2, %v3292_v21, %v670_v39  ;;  %2724 = vpow2.f32 %v605_v34 }
 0x12d   : > { %v2715_v18 = vpop.eup %2714  ;;  %v766_v47 = vmul.f32 1.050701, %v734_v44  ;;  %vm706_vm8 = vcmp.gt.f32.partialorder %v3324_v49, 0.0  ;;  %2726 = vpow2.f32 %v611_v37  ;;  %v607_v15 = vmul.f32 1.442695, %v550_v41 }
 0x12e   : > { %v788_v48 = vpack.c.bf16 %v764_v31, %v3334_v24  ;;  %v2717_v50 = vpop.eup %2716  ;;  %v2218_v51 = vadd.f32 -1.0, %v2715_v18  ;;  %v3374_v52 = vadd.f32 %v2446_v13, %v3179_v62  ;;  %v3377_v54 = vadd.f32 %v3179_v62, %v510_v0 }
 0x12f   : > { %v3380_v8 = vadd.f32 %v2447_v28, %v3179_v62  ;;  %v2719_v21 = vpop.eup %2718  ;;  %v735_v55 = vsel %vm703_vm3, %v3271_v53, %v671_v40  ;;  %v2216_v56 = vadd.f32 -1.0, %v2717_v50  ;;  %2728 = vpow2.f32 %v607_v15 }
 0x130   : > { %2477 = vmatmul.mubr.bf16.gmra.mrb[12].mxu1 %v788_v48  ;;  %v789_v58 = vpack.c.bf16 %v766_v47, %v765_v43  ;;  %v736_v59 = vsel %vm704_vm4, %v3289_v9, %v672_v2  ;;  %v675_v60 = vmul.f32 1.6732632, %v2218_v51  ;;  %v2219_v61 = vadd.f32 -1.0, %v2719_v21 }
 0x131   : > { %v555_v1 = vmin.f32 %v3374_v52, 0.0  ;;  %v2721_v3 = vpop.eup %2720  ;;  %v673_v24 = vmul.f32 1.6732632, %v2216_v56  ;;  %v553_v57 = vmin.f32 %v3377_v54, 0.0  ;;  %v556_v4 = vmin.f32 %v3380_v8, 0.0 }
 0x132   : > { %v3392_v53 = vadd.f32 %v3179_v62, %v513_v38  ;;  %2480 = vmatprep.mubr.bf16.mxu1 %v789_v58  ;;  %v739_v6 = vsel %vm707_vm5, %v3314_v42, %v675_v60  ;;  %v676_v11 = vmul.f32 1.6732632, %v2219_v61  ;;  %v2217_v9 = vadd.f32 -1.0, %v2721_v3 }
 0x133   : > { %v617_v12 = vmul.f32 1.442695, %v555_v1  ;;  %v768_v63 = vmul.f32 1.050701, %v736_v59  ;;  %v737_v13 = vsel %vm705_vm6, %v3317_v46, %v673_v24  ;;  %v613_v14 = vmul.f32 1.442695, %v553_v57 }
 0x134   : > { %v619_v17 = vmul.f32 1.442695, %v556_v4  ;;  %v767_v19 = vmul.f32 1.050701, %v735_v55  ;;  %v740_v62 = vsel %vm708_vm7, %v3320_v33, %v676_v11  ;;  %v674_v20 = vmul.f32 1.6732632, %v2217_v9 }
 0x135   : > { %2730 = vpow2.f32 %v617_v12  ;;  %v2723_v22 = vpop.eup %2722  ;;  %v771_v0 = vmul.f32 1.050701, %v739_v6  ;;  %v772_v42 = vmul.f32 1.050701, %v740_v62  ;;  %v554_v5 = vmin.f32 %v3392_v53, 0.0 }
 0x136   : > { %2732 = vpow2.f32 %v613_v14  ;;  %v2725_v25 = vpop.eup %2724  ;;  %v769_v26 = vmul.f32 1.050701, %v737_v13  ;;  %v738_v46 = vsel %vm706_vm8, %v3324_v49, %v674_v20  ;;  %v2222_v28 = vadd.f32 -1.0, %v2723_v22  ;;  %v3441_v13 = vld [vmem:[%s4074_s4 + $0x8] sm:$0xff]   ;;  %v3449_v14 = vld [vmem:[%s4074_s4 + $0x10] sm:$0xff]  }
 0x137   : > { %2734 = vpow2.f32 %v619_v17  ;;  %v2727_v16 = vpop.eup %2726  ;;  %v770_v29 = vmul.f32 1.050701, %v738_v46  ;;  %v2220_v45 = vadd.f32 -1.0, %v2725_v25  ;;  %v615_v33 = vmul.f32 1.442695, %v554_v5  ;;  %v3456_v17 = vld [vmem:[%s4074_s4 + $0x18] sm:$0xff]  }
 0x138   : > { %v790_v30 = vpack.c.bf16 %v768_v63, %v767_v19  ;;  %v679_v31 = vmul.f32 1.6732632, %v2222_v28  ;;  %v2223_v32 = vadd.f32 -1.0, %v2727_v16  ;;  %v792_v34 = vpack.c.bf16 %v772_v42, %v771_v0  ;;  %v3435_v63 = vld [vmem:[%s4074_s4] sm:$0xff]  }
 0x139   : > { %v2729_v36 = vpop.eup %2728  ;;  %vm711_vm9 = vcmp.gt.f32.partialorder %v3341_v7, 0.0  ;;  %v677_v35 = vmul.f32 1.6732632, %v2220_v45  ;;  %2736 = vpow2.f32 %v615_v33  ;;  %v791_v39 = vpack.c.bf16 %v770_v29, %v769_v26  ;;  %2592 = vmatprep.subr.bf16.mxu1 %v3435_v63  ;;  %v3464_v19 = vld [vmem:[%s4075_s5 + $0x1] ss:$0 sm:$0xff] }
 0x13a   : > { %2481 = vmatmul.mubr.bf16.gmra.mrb[16].mxu1 %v790_v30  ;;  %v743_v37 = vsel %vm711_vm9, %v3341_v7, %v679_v31  ;;  %v680_v49 = vmul.f32 1.6732632, %v2223_v32  ;;  %v2221_v38 = vadd.f32 -1.0, %v2729_v36  ;;  %vm709_vm10 = vcmp.gt.f32.partialorder %v3344_v10, 0.0 }
 0x13b   : > { %vm712_vm11 = vcmp.gt.f32.partialorder %v3347_v23, 0.0  ;;  %2484 = vmatprep.mubr.bf16.mxu1 %v791_v39  ;;  %v741_v40 = vsel %vm709_vm10, %v3344_v10, %v677_v35  ;;  %v775_v2 = vmul.f32 1.050701, %v743_v37  ;;  %vm710_vm12 = vcmp.gt.f32.partialorder %v3358_v27, 0.0  ;;  %2600 = vmatpush3.bf16.msra.mxu1 %v3435_v63 }
 0x13c   : > { %v744_v41 = vsel %vm712_vm11, %v3347_v23, %v680_v49  ;;  %v678_v43 = vmul.f32 1.6732632, %v2221_v38  ;;  %v773_v15 = vmul.f32 1.050701, %v741_v40  ;;  %vm715_vm13 = vcmp.gt.f32.partialorder %v3374_v52, 0.0  ;;  %2593 = vmatprep.subr.bf16.mxu1 %v3441_v13 }
 0x13d   : > { %v776_v44 = vmul.f32 1.050701, %v744_v41  ;;  %vm716_vm14 = vcmp.gt.f32.partialorder %v3380_v8, 0.0  ;;  %vm713_vm15 = vcmp.gt.f32.partialorder %v3377_v54, 0.0  ;;  %vm714_vm0 = vcmp.gt.f32.partialorder %v3392_v53, 0.0 }
 0x13e   : > { %v742_v47 = vsel %vm710_vm12, %v3358_v27, %v678_v43 }
 0x13f   : > { %v2731_v18 = vpop.eup %2730  ;;  %v774_v48 = vmul.f32 1.050701, %v742_v47  ;;  %v794_v51 = vpack.c.bf16 %v776_v44, %v775_v2  ;;  %2601 = vmatpush3.bf16.msra.mxu1 %v3441_v13 }
 0x140   : > { %v2733_v7 = vpop.eup %2732  ;;  %v2226_v50 = vadd.f32 -1.0, %v2731_v18  ;;  %2594 = vmatprep.subr.bf16.mxu1 %v3449_v14 }
 0x141   : > { %v2735_v21 = vpop.eup %2734  ;;  %v2224_v55 = vadd.f32 -1.0, %v2733_v7  ;;  %v793_v10 = vpack.c.bf16 %v774_v48, %v773_v15 }
 0x142   : > { %v683_v56 = vmul.f32 1.6732632, %v2226_v50  ;;  %v2227_v58 = vadd.f32 -1.0, %v2735_v21  ;;  %2485 = vmatmul.mubr.bf16.gmra.mrb[20].mxu1 %v792_v34 }
 0x143   : > { %v681_v23 = vmul.f32 1.6732632, %v2224_v55  ;;  %v2737_v59 = vpop.eup %2736  ;;  %2488 = vmatprep.mubr.bf16.mxu1 %v793_v10  ;;  %2602 = vmatpush3.bf16.msra.mxu1 %v3449_v14 }
 0x144   : > { %v747_v60 = vsel %vm715_vm13, %v3374_v52, %v683_v56  ;;  %v684_v61 = vmul.f32 1.6732632, %v2227_v58  ;;  %v2225_v27 = vadd.f32 -1.0, %v2737_v59  ;;  %2595 = vmatprep.subr.bf16.mxu1 %v3456_v17 }
 0x145   : > { %v779_v3 = vmul.f32 1.050701, %v747_v60  ;;  %v745_v24 = vsel %vm713_vm15, %v3377_v54, %v681_v23  ;;  %v2664_v54 = vld [vmem:[%s4073_s3 + $0x30] sm:$0xff]  }
 0x146   : > { %v748_v1 = vsel %vm716_vm14, %v3380_v8, %v684_v61  ;;  %v682_v4 = vmul.f32 1.6732632, %v2225_v27  ;;  %v777_v52 = vmul.f32 1.050701, %v745_v24  ;;  %v2663_v8 = vld [vmem:[%s4073_s3 + $0x28] sm:$0xff]  }
 0x147   : > { %v780_v57 = vmul.f32 1.050701, %v748_v1  ;;  %2506 = vmatprep.subr.bf16.mxu0 %v2663_v8  ;;  %2603 = vmatpush3.bf16.msra.mxu1 %v3456_v17 }
 0x148   : > { %v746_v6 = vsel %vm714_vm0, %v3392_v53, %v682_v4  ;;  %2507 = vmatpush3.bf16.msra.mxu0 %v2663_v8  ;;  %v2665_v53 = vld [vmem:[%s4073_s3 + $0x38] sm:$0xff]  }
 0x149   : > { %v796_v11 = vpack.c.bf16 %v780_v57, %v779_v3  ;;  %v778_v9 = vmul.f32 1.050701, %v746_v6  ;;  %2508 = vmatprep.subr.bf16.mxu0 %v2664_v54 }
 0x14a   : > { %2489 = vmatmul.mubr.bf16.gmra.mrb[24].mxu1 %v794_v51 }
 0x14b   : > { %v795_v12 = vpack.c.bf16 %v778_v9, %v777_v52 }
 0x14c   : > { %2509 = vmatpush3.bf16.msra.mxu0 %v2664_v54 }
 0x14d   : > { %2492 = vmatprep.mubr.bf16.mxu1 %v795_v12  ;;  %2510 = vmatprep.subr.bf16.mxu0 %v2665_v53 }
 0x150   : > { %2511 = vmatpush3.bf16.msra.mxu0 %v2665_v53 }
 0x151   : > { %2544 = vmatprep.subr.bf16.mxu0 %v3435_v63 }
 0x152   : > { %2493 = vmatmul.mubr.bf16.gmra.mrb[28].mxu1 %v796_v11 }
 0x1e8   : > { %v2466_v62 = vpop.f32.mrb[0].mxu1 }
 0x1e9   : > { %v909_v20 = vadd.f32 %v2466_v62, %v3464_v19  ;;  %v900_v22 = vpop.f32.mrb[1].mxu1 }
 0x1ea   : > { %v3468_v0 = vadd.f32 %v3464_v19, %v900_v22  ;;  %v2467_v42 = vpop.f32.mrb[2].mxu1 }
 0x1eb   : > { %v1029_v5 = vmin.f32 %v909_v20, 0.0  ;;  %v3471_v25 = vadd.f32 %v2467_v42, %v3464_v19  ;;  %v903_v26 = vpop.f32.mrb[3].mxu1  ;;  %vm1189_vm1 = vcmp.gt.f32.partialorder %v909_v20, 0.0 }
 0x1ec   : > { %v1027_v46 = vmin.f32 %v3468_v0, 0.0  ;;  %v3475_v28 = vadd.f32 %v3464_v19, %v903_v26  ;;  %vm1187_vm2 = vcmp.gt.f32.partialorder %v3468_v0, 0.0 }
 0x1ed   : > { %v1063_v16 = vmul.f32 1.442695, %v1029_v5  ;;  %v1030_v29 = vmin.f32 %v3471_v25, 0.0  ;;  %vm1190_vm3 = vcmp.gt.f32.partialorder %v3471_v25, 0.0 }
 0x1ee   : > { %v1059_v45 = vmul.f32 1.442695, %v1027_v46  ;;  %v1028_v33 = vmin.f32 %v3475_v28, 0.0  ;;  %vm1188_vm4 = vcmp.gt.f32.partialorder %v3475_v28, 0.0 }
 0x1ef   : > { %2738 = vpow2.f32 %v1063_v16  ;;  %v1065_v30 = vmul.f32 1.442695, %v1030_v29 }
 0x1f0   : > { %2740 = vpow2.f32 %v1059_v45  ;;  %v1061_v31 = vmul.f32 1.442695, %v1028_v33  ;;  %v2470_v32 = vpop.f32.mrb[4].mxu1 }
 0x1f1   : > { %2742 = vpow2.f32 %v1065_v30  ;;  %v3480_v34 = vadd.f32 %v2470_v32, %v3464_v19  ;;  %v916_v36 = vpop.f32.mrb[5].mxu1 }
 0x1f2   : > { %2744 = vpow2.f32 %v1061_v31  ;;  %v3483_v35 = vadd.f32 %v3464_v19, %v916_v36  ;;  %v2471_v39 = vpop.f32.mrb[6].mxu1 }
 0x1f3   : > { %v1033_v37 = vmin.f32 %v3480_v34, 0.0  ;;  %v3487_v49 = vadd.f32 %v2471_v39, %v3464_v19  ;;  %v919_v38 = vpop.f32.mrb[7].mxu1  ;;  %vm1193_vm5 = vcmp.gt.f32.partialorder %v3480_v34, 0.0 }
 0x1f4   : > { %v1031_v40 = vmin.f32 %v3483_v35, 0.0  ;;  %v3491_v41 = vadd.f32 %v3464_v19, %v919_v38  ;;  %vm1191_vm6 = vcmp.gt.f32.partialorder %v3483_v35, 0.0 }
 0x1f5   : > { %v1071_v43 = vmul.f32 1.442695, %v1033_v37  ;;  %v1034_v2 = vmin.f32 %v3487_v49, 0.0  ;;  %vm1194_vm7 = vcmp.gt.f32.partialorder %v3487_v49, 0.0 }
 0x1f6   : > { %v1067_v44 = vmul.f32 1.442695, %v1031_v40  ;;  %v1032_v18 = vmin.f32 %v3491_v41, 0.0  ;;  %vm1192_vm8 = vcmp.gt.f32.partialorder %v3491_v41, 0.0 }
 0x1f7   : > { %2746 = vpow2.f32 %v1071_v43  ;;  %v1073_v47 = vmul.f32 1.442695, %v1034_v2 }
 0x1f8   : > { %2748 = vpow2.f32 %v1067_v44  ;;  %v1069_v7 = vmul.f32 1.442695, %v1032_v18  ;;  %v2474_v15 = vpop.f32.mrb[8].mxu1 }
 0x1f9   : > { %v2739_v48 = vpop.eup %2738  ;;  %2750 = vpow2.f32 %v1073_v47  ;;  %v3496_v50 = vadd.f32 %v2474_v15, %v3464_v19  ;;  %v932_v51 = vpop.f32.mrb[9].mxu1 }
 0x1fa   : > { %v2741_v21 = vpop.eup %2740  ;;  %v2239_v55 = vadd.f32 -1.0, %v2739_v48  ;;  %2752 = vpow2.f32 %v1069_v7  ;;  %v3499_v56 = vadd.f32 %v3464_v19, %v932_v51  ;;  %v2475_v58 = vpop.f32.mrb[10].mxu1 }
 0x1fb   : > { %v2743_v10 = vpop.eup %2742  ;;  %v2237_v23 = vadd.f32 -1.0, %v2741_v21  ;;  %v1037_v59 = vmin.f32 %v3496_v50, 0.0  ;;  %v3503_v60 = vadd.f32 %v2475_v58, %v3464_v19  ;;  %v935_v61 = vpop.f32.mrb[11].mxu1  ;;  %vm1197_vm9 = vcmp.gt.f32.partialorder %v3496_v50, 0.0 }
 0x1fc   : > { %v2745_v27 = vpop.eup %2744  ;;  %v1157_v1 = vmul.f32 1.6732632, %v2239_v55  ;;  %v2240_v3 = vadd.f32 -1.0, %v2743_v10  ;;  %v1035_v24 = vmin.f32 %v3499_v56, 0.0  ;;  %vm1195_vm11 = vcmp.gt.f32.partialorder %v3499_v56, 0.0 }
 0x1fd   : > { %v2238_v57 = vadd.f32 -1.0, %v2745_v27  ;;  %v1079_v4 = vmul.f32 1.442695, %v1037_v59  ;;  %v1038_v6 = vmin.f32 %v3503_v60, 0.0  ;;  %v1155_v12 = vmul.f32 1.6732632, %v2237_v23 }
 0x1fe   : > { %v1221_v11 = vsel %vm1189_vm1, %v909_v20, %v1157_v1  ;;  %v1158_v52 = vmul.f32 1.6732632, %v2240_v3  ;;  %v1075_v9 = vmul.f32 1.442695, %v1035_v24  ;;  %v3517_v20 = vadd.f32 %v3464_v19, %v935_v61 }
 0x1ff   : > { %2754 = vpow2.f32 %v1079_v4  ;;  %v1156_v54 = vmul.f32 1.6732632, %v2238_v57  ;;  %v1081_v53 = vmul.f32 1.442695, %v1038_v6  ;;  %v3511_v22 = vmul.f32 1.050701, %v1221_v11 }
 0x200   : > { %v1222_v8 = vsel %vm1190_vm3, %v3471_v25, %v1158_v52  ;;  %2756 = vpow2.f32 %v1075_v9  ;;  %v1219_v45 = vsel %vm1187_vm2, %v3468_v0, %v1155_v12  ;;  %v1036_v31 = vmin.f32 %v3517_v20, 0.0 }
 0x201   : > { %v2747_v62 = vpop.eup %2746  ;;  %v3513_v42 = vmul.f32 1.050701, %v1222_v8  ;;  %2758 = vpow2.f32 %v1081_v53  ;;  %v1220_v39 = vsel %vm1188_vm4, %v3475_v28, %v1156_v54  ;;  %v1251_v21 = vmul.f32 1.050701, %v1219_v45 }
 0x202   : > { %v2749_v26 = vpop.eup %2748  ;;  %v2243_v46 = vadd.f32 -1.0, %v2747_v62  ;;  %v1077_v0 = vmul.f32 1.442695, %v1036_v31  ;;  %v1252_v48 = vmul.f32 1.050701, %v1220_v39  ;;  %vm1198_vm10 = vcmp.gt.f32.partialorder %v3503_v60, 0.0 }
 0x203   : > { %v2478_v5 = vpop.f32.mrb[12].mxu1  ;;  %v2751_v29 = vpop.eup %2750  ;;  %v1284_v33 = vpack.c.bf16 %v3513_v42, %v3511_v22  ;;  %v2241_v30 = vadd.f32 -1.0, %v2749_v26  ;;  %vm1196_vm12 = vcmp.gt.f32.partialorder %v3517_v20, 0.0 }
 0x204   : > { %v3521_v25 = vadd.f32 %v2478_v5, %v3464_v19  ;;  %v948_v16 = vpop.f32.mrb[13].mxu1  ;;  %v2753_v36 = vpop.eup %2752  ;;  %v1161_v37 = vmul.f32 1.6732632, %v2243_v46  ;;  %v2244_v38 = vadd.f32 -1.0, %v2751_v29  ;;  %2760 = vpow2.f32 %v1077_v0 }
 0x205   : > { %v2479_v32 = vpop.f32.mrb[14].mxu1  ;;  %v1159_v2 = vmul.f32 1.6732632, %v2241_v30  ;;  %v2242_v44 = vadd.f32 -1.0, %v2753_v36  ;;  %v3534_v18 = vadd.f32 %v3464_v19, %v948_v16  ;;  %v1283_v11 = vpack.c.bf16 %v1252_v48, %v1251_v21 }
 0x206   : > { %v1041_v40 = vmin.f32 %v3521_v25, 0.0  ;;  %v951_v43 = vpop.f32.mrb[15].mxu1  ;;  %v1162_v47 = vmul.f32 1.6732632, %v2244_v38  ;;  %v3538_v15 = vadd.f32 %v2479_v32, %v3464_v19  ;;  %v1225_v10 = vsel %vm1193_vm5, %v3480_v34, %v1161_v37 }
 0x207   : > { %v1223_v28 = vsel %vm1191_vm6, %v3483_v35, %v1159_v2  ;;  %v1160_v51 = vmul.f32 1.6732632, %v2242_v44  ;;  %v1039_v55 = vmin.f32 %v3534_v18, 0.0  ;;  %v3554_v6 = vadd.f32 %v3464_v19, %v951_v43  ;;  %2512 = vmatprep.mubr.bf16.mxu0 %v1283_v11 }
 0x208   : > { %v1087_v7 = vmul.f32 1.442695, %v1041_v40  ;;  %v1255_v23 = vmul.f32 1.050701, %v1223_v28  ;;  %v1042_v61 = vmin.f32 %v3538_v15, 0.0  ;;  %v1226_v35 = vsel %vm1194_vm7, %v3487_v49, %v1162_v47  ;;  %2513 = vmatmul.mubr.bf16.vlgmr.msra.gmra.mrb[32].mxu0 %v1284_v33 }
 0x209   : > { %v2755_v58 = vpop.eup %2754  ;;  %v1224_v59 = vsel %vm1192_vm8, %v3491_v41, %v1160_v51  ;;  %v1083_v24 = vmul.f32 1.442695, %v1039_v55  ;;  %v1258_v49 = vmul.f32 1.050701, %v1226_v35  ;;  %v1040_v53 = vmin.f32 %v3554_v6, 0.0  ;;  %2545 = vmatpush3.bf16.msra.mxu0 %v3435_v63 }
 0x20a   : > { %2762 = vpow2.f32 %v1087_v7  ;;  %v2757_v27 = vpop.eup %2756  ;;  %v1256_v1 = vmul.f32 1.050701, %v1224_v59  ;;  %v2247_v3 = vadd.f32 -1.0, %v2755_v58  ;;  %v1089_v4 = vmul.f32 1.442695, %v1042_v61  ;;  %2546 = vmatprep.subr.bf16.mxu0 %v3441_v13 }
 0x20b   : > { %v2245_v57 = vadd.f32 -1.0, %v2757_v27  ;;  %v2759_v52 = vpop.eup %2758  ;;  %v1257_v22 = vmul.f32 1.050701, %v1225_v10  ;;  %v1085_v16 = vmul.f32 1.442695, %v1040_v53  ;;  %vm1201_vm13 = vcmp.gt.f32.partialorder %v3521_v25, 0.0 }
 0x20c   : > { %v1165_v9 = vmul.f32 1.6732632, %v2247_v3  ;;  %v1285_v8 = vpack.c.bf16 %v1256_v1, %v1255_v23  ;;  %v2248_v54 = vadd.f32 -1.0, %v2759_v52  ;;  %2764 = vpow2.f32 %v1089_v4 }
 0x20d   : > { %v2482_v34 = vpop.f32.mrb[16].mxu1  ;;  %2766 = vpow2.f32 %v1083_v24  ;;  %v1163_v26 = vmul.f32 1.6732632, %v2245_v57  ;;  %v1286_v36 = vpack.c.bf16 %v1258_v49, %v1257_v22  ;;  %2547 = vmatpush3.bf16.msra.mxu0 %v3441_v13  ;;  %vm1199_vm14 = vcmp.gt.f32.partialorder %v3534_v18, 0.0 }
 0x20e   : > { %v3558_v41 = vadd.f32 %v2482_v34, %v3464_v19  ;;  %v964_v12 = vpop.f32.mrb[17].mxu1  ;;  %v1166_v46 = vmul.f32 1.6732632, %v2248_v54  ;;  %2516 = vmatprep.mubr.bf16.mxu0 %v1285_v8  ;;  %v1229_v29 = vsel %vm1197_vm9, %v3496_v50, %v1165_v9  ;;  %v2761_v33 = vpop.eup %2760  ;;  %2768 = vpow2.f32 %v1085_v16  ;;  %2548 = vmatprep.subr.bf16.mxu0 %v3449_v14 }
 0x20f   : > { %v2483_v62 = vpop.f32.mrb[18].mxu1  ;;  %v3568_v30 = vadd.f32 %v3464_v19, %v964_v12  ;;  %v2246_v37 = vadd.f32 -1.0, %v2761_v33  ;;  %v3583_v40 = vmul.f32 1.050701, %v1229_v29  ;;  %v1227_v2 = vsel %vm1195_vm11, %v3499_v56, %v1163_v26 }
 0x210   : > { %v1045_v42 = vmin.f32 %v3558_v41, 0.0  ;;  %v967_v5 = vpop.f32.mrb[19].mxu1  ;;  %v3571_v31 = vadd.f32 %v2483_v62, %v3464_v19  ;;  %v1230_v32 = vsel %vm1198_vm10, %v3503_v60, %v1166_v46  ;;  %2517 = vmatmul.mubr.bf16.gmra.mrb[36].mxu0 %v1286_v36  ;;  %vm1202_vm15 = vcmp.gt.f32.partialorder %v3538_v15, 0.0 }
 0x211   : > { %v3578_v63 = vadd.f32 %v3464_v19, %v967_v5  ;;  %v3580_v39 = vmul.f32 1.050701, %v1230_v32  ;;  %v1043_v38 = vmin.f32 %v3568_v30, 0.0  ;;  %v1164_v44 = vmul.f32 1.6732632, %v2246_v37  ;;  %2549 = vmatpush3.bf16.msra.mxu0 %v3449_v14 }
 0x212   : > { %v1095_v45 = vmul.f32 1.442695, %v1045_v42  ;;  %v1046_v60 = vmin.f32 %v3571_v31, 0.0  ;;  %2550 = vmatprep.subr.bf16.mxu0 %v3456_v17  ;;  %vm1200_vm0 = vcmp.gt.f32.partialorder %v3554_v6, 0.0  ;;  %vm1203_vm1 = vcmp.gt.f32.partialorder %v3568_v30, 0.0 }
 0x213   : > { %v1091_v0 = vmul.f32 1.442695, %v1043_v38  ;;  %v1044_v47 = vmin.f32 %v3578_v63, 0.0  ;;  %v1288_v21 = vpack.c.bf16 %v3580_v39, %v3583_v40  ;;  %v1228_v55 = vsel %vm1196_vm12, %v3517_v20, %v1164_v44 }
 0x214   : > { %v2763_v50 = vpop.eup %2762  ;;  %2770 = vpow2.f32 %v1095_v45  ;;  %v1097_v48 = vmul.f32 1.442695, %v1046_v60  ;;  %v1260_v23 = vmul.f32 1.050701, %v1228_v55  ;;  %v1259_v20 = vmul.f32 1.050701, %v1227_v2 }
 0x215   : > { %v2486_v43 = vpop.f32.mrb[20].mxu1  ;;  %v2251_v7 = vadd.f32 -1.0, %v2763_v50  ;;  %2772 = vpow2.f32 %v1091_v0  ;;  %v1093_v13 = vmul.f32 1.442695, %v1044_v47  ;;  %2551 = vmatpush3.bf16.msra.mxu0 %v3456_v17  ;;  %vm1205_vm2 = vcmp.gt.f32.partialorder %v3558_v41, 0.0 }
 0x216   : > { %v3593_v28 = vadd.f32 %v2486_v43, %v3464_v19  ;;  %v980_v51 = vpop.f32.mrb[21].mxu1  ;;  %v2765_v10 = vpop.eup %2764  ;;  %2774 = vpow2.f32 %v1097_v48  ;;  %v1287_v9 = vpack.c.bf16 %v1260_v23, %v1259_v20  ;;  %vm1204_vm3 = vcmp.gt.f32.partialorder %v3578_v63, 0.0 }
 0x217   : > { %v3599_v56 = vadd.f32 %v3464_v19, %v980_v51  ;;  %v2487_v58 = vpop.f32.mrb[22].mxu1  ;;  %v2767_v61 = vpop.eup %2766  ;;  %v2252_v27 = vadd.f32 -1.0, %v2765_v10  ;;  %2776 = vpow2.f32 %v1093_v13  ;;  %v1169_v1 = vmul.f32 1.6732632, %v2251_v7 }
 0x218   : > { %v983_v59 = vpop.f32.mrb[23].mxu1  ;;  %v1049_v35 = vmin.f32 %v3593_v28, 0.0  ;;  %v3608_v4 = vadd.f32 %v2487_v58, %v3464_v19  ;;  %v2769_v11 = vpop.eup %2768  ;;  %v2249_v34 = vadd.f32 -1.0, %v2767_v61  ;;  %2520 = vmatprep.mubr.bf16.mxu0 %v1287_v9  ;;  %vm1206_vm4 = vcmp.gt.f32.partialorder %v3571_v31, 0.0 }
 0x219   : > { %v1047_v3 = vmin.f32 %v3599_v56, 0.0  ;;  %v1170_v24 = vmul.f32 1.6732632, %v2252_v27  ;;  %v3611_v14 = vadd.f32 %v3464_v19, %v983_v59  ;;  %v2250_v49 = vadd.f32 -1.0, %v2769_v11  ;;  %2521 = vmatmul.mubr.bf16.gmra.mrb[40].mxu0 %v1288_v21 }
 0x21a   : > { %v1103_v57 = vmul.f32 1.442695, %v1049_v35  ;;  %v1233_v53 = vsel %vm1201_vm13, %v3521_v25, %v1169_v1  ;;  %v1050_v22 = vmin.f32 %v3608_v4, 0.0  ;;  %v1167_v25 = vmul.f32 1.6732632, %v2249_v34 }
 0x21b   : > { %v1099_v52 = vmul.f32 1.442695, %v1047_v3  ;;  %v1234_v42 = vsel %vm1202_vm15, %v3538_v15, %v1170_v24  ;;  %v1168_v5 = vmul.f32 1.6732632, %v2250_v49  ;;  %v1048_v26 = vmin.f32 %v3611_v14, 0.0 }
 0x21c   : > { %2778 = vpow2.f32 %v1103_v57  ;;  %v1105_v16 = vmul.f32 1.442695, %v1050_v22  ;;  %v3633_v32 = vmul.f32 1.050701, %v1233_v53  ;;  %v1266_v37 = vmul.f32 1.050701, %v1234_v42 }
 0x21d   : > { %v2490_v12 = vpop.f32.mrb[24].mxu1  ;;  %2780 = vpow2.f32 %v1099_v52  ;;  %v1232_v15 = vsel %vm1200_vm0, %v3554_v6, %v1168_v5  ;;  %v1101_v36 = vmul.f32 1.442695, %v1048_v26  ;;  %vm1209_vm5 = vcmp.gt.f32.partialorder %v3593_v28, 0.0 }
 0x21e   : > { %v2771_v8 = vpop.eup %2770  ;;  %v996_v54 = vpop.f32.mrb[25].mxu1  ;;  %v3628_v29 = vadd.f32 %v2490_v12, %v3464_v19  ;;  %2782 = vpow2.f32 %v1105_v16  ;;  %v1264_v43 = vmul.f32 1.050701, %v1232_v15  ;;  %v1231_v6 = vsel %vm1199_vm14, %v3534_v18, %v1167_v25 }
 0x21f   : > { %v2255_v62 = vadd.f32 -1.0, %v2771_v8  ;;  %v2491_v17 = vpop.f32.mrb[26].mxu1  ;;  %v3631_v45 = vadd.f32 %v3464_v19, %v996_v54  ;;  %v2773_v33 = vpop.eup %2772  ;;  %2784 = vpow2.f32 %v1101_v36  ;;  %vm1207_vm6 = vcmp.gt.f32.partialorder %v3599_v56, 0.0 }
 0x220   : > { %v999_v46 = vpop.f32.mrb[27].mxu1  ;;  %v3640_v50 = vadd.f32 %v2491_v17, %v3464_v19  ;;  %v2775_v39 = vpop.eup %2774  ;;  %v2253_v40 = vadd.f32 -1.0, %v2773_v33  ;;  %v1053_v44 = vmin.f32 %v3628_v29, 0.0  ;;  %v1263_v61 = vmul.f32 1.050701, %v1231_v6 }
 0x221   : > { %v1173_v38 = vmul.f32 1.6732632, %v2255_v62  ;;  %v2777_v60 = vpop.eup %2776  ;;  %v2256_v2 = vadd.f32 -1.0, %v2775_v39  ;;  %v1051_v7 = vmin.f32 %v3631_v45, 0.0  ;;  %v3650_v13 = vadd.f32 %v3464_v19, %v999_v46 }
 0x222   : > { %v1171_v0 = vmul.f32 1.6732632, %v2253_v40  ;;  %v2254_v47 = vadd.f32 -1.0, %v2777_v60  ;;  %v1111_v21 = vmul.f32 1.442695, %v1053_v44  ;;  %v1054_v55 = vmin.f32 %v3640_v50, 0.0 }
 0x223   : > { %v1174_v51 = vmul.f32 1.6732632, %v2256_v2  ;;  %v1107_v18 = vmul.f32 1.442695, %v1051_v7  ;;  %v1237_v27 = vsel %vm1205_vm2, %v3558_v41, %v1173_v38  ;;  %v1052_v52 = vmin.f32 %v3650_v13, 0.0 }
 0x224   : > { %v1235_v58 = vsel %vm1203_vm1, %v3568_v30, %v1171_v0  ;;  %v1172_v10 = vmul.f32 1.6732632, %v2254_v47  ;;  %2786 = vpow2.f32 %v1111_v21  ;;  %v1113_v35 = vmul.f32 1.442695, %v1054_v55 }
 0x225   : > { %v2494_v48 = vpop.f32.mrb[28].mxu1  ;;  %v1267_v3 = vmul.f32 1.050701, %v1235_v58  ;;  %2788 = vpow2.f32 %v1107_v18  ;;  %v1238_v41 = vsel %vm1206_vm4, %v3571_v31, %v1174_v51  ;;  %v1289_v12 = vpack.c.bf16 %v1264_v43, %v1263_v61 }
 0x226   : > { %v1012_v23 = vpop.f32.mrb[29].mxu1  ;;  %v2779_v59 = vpop.eup %2778  ;;  %v1236_v30 = vsel %vm1204_vm3, %v3578_v63, %v1172_v10  ;;  %2790 = vpow2.f32 %v1113_v35  ;;  %v1290_v8 = vpack.c.bf16 %v1266_v37, %v3633_v32  ;;  %v1109_v54 = vmul.f32 1.442695, %v1052_v52 }
 0x227   : > { %v2495_v20 = vpop.f32.mrb[30].mxu1  ;;  %v2781_v1 = vpop.eup %2780  ;;  %v2259_v24 = vadd.f32 -1.0, %v2779_v59  ;;  %v1268_v11 = vmul.f32 1.050701, %v1236_v30  ;;  %v3668_v63 = vadd.f32 %v2494_v48, %v3464_v19  ;;  %v3671_v53 = vadd.f32 %v3464_v19, %v1012_v23  ;;  %2524 = vmatprep.mubr.bf16.mxu0 %v1289_v12 }
 0x228   : > { %v1015_v57 = vpop.f32.mrb[31].mxu1  ;;  %v2257_v34 = vadd.f32 -1.0, %v2781_v1  ;;  %v2783_v62 = vpop.eup %2782  ;;  %v3677_v31 = vadd.f32 %v2495_v20, %v3464_v19  ;;  %v1269_v26 = vmul.f32 1.050701, %v1237_v27  ;;  %vm1210_vm7 = vcmp.gt.f32.partialorder %v3608_v4, 0.0  ;;  %2525 = vmatmul.mubr.bf16.gmra.mrb[44].mxu0 %v1290_v8 }
 0x229   : > { %v1177_v9 = vmul.f32 1.6732632, %v2259_v24  ;;  %v3680_v17 = vadd.f32 %v3464_v19, %v1015_v57  ;;  %v1291_v42 = vpack.c.bf16 %v1268_v11, %v1267_v3  ;;  %v2785_v5 = vpop.eup %2784  ;;  %v2260_v46 = vadd.f32 -1.0, %v2783_v62 }
 0x22a   : > { %v1175_v49 = vmul.f32 1.6732632, %v2257_v34  ;;  %2792 = vpow2.f32 %v1109_v54  ;;  %v1270_v25 = vmul.f32 1.050701, %v1238_v41  ;;  %v2258_v16 = vadd.f32 -1.0, %v2785_v5 }
 0x22b   : > { %v1241_v22 = vsel %vm1209_vm5, %v3593_v28, %v1177_v9  ;;  %v1057_v33 = vmin.f32 %v3668_v63, 0.0  ;;  %2528 = vmatprep.mubr.bf16.mxu0 %v1291_v42  ;;  %v1178_v19 = vmul.f32 1.6732632, %v2260_v46  ;;  %v1055_v15 = vmin.f32 %v3671_v53, 0.0 }
 0x22c   : > { %v1239_v28 = vsel %vm1207_vm6, %v3599_v56, %v1175_v49  ;;  %v1273_v32 = vmul.f32 1.050701, %v1241_v22  ;;  %v1058_v36 = vmin.f32 %v3677_v31, 0.0  ;;  %v1176_v39 = vmul.f32 1.6732632, %v2258_v16 }
 0x22d   : > { %vm1208_vm8 = vcmp.gt.f32.partialorder %v3611_v14, 0.0  ;;  %v1119_v37 = vmul.f32 1.442695, %v1057_v33  ;;  %v1056_v38 = vmin.f32 %v3680_v17, 0.0  ;;  %v1271_v60 = vmul.f32 1.050701, %v1239_v28 }
 0x22e   : > { %v2787_v40 = vpop.eup %2786  ;;  %v1242_v56 = vsel %vm1210_vm7, %v3608_v4, %v1178_v19  ;;  %v1115_v43 = vmul.f32 1.442695, %v1055_v15  ;;  %v1121_v2 = vmul.f32 1.442695, %v1058_v36  ;;  %v1240_v0 = vsel %vm1208_vm8, %v3611_v14, %v1176_v39  ;;  %v2673_v19 = vld [vmem:[%s4074_s4 + $0x38] sm:$0xff]  }
 0x22f   : > { %v2789_v44 = vpop.eup %2788  ;;  %v1274_v6 = vmul.f32 1.050701, %v1242_v56  ;;  %v2263_v47 = vadd.f32 -1.0, %v2787_v40  ;;  %2794 = vpow2.f32 %v1119_v37  ;;  %v1272_v48 = vmul.f32 1.050701, %v1240_v0 }
 0x230   : > { %v2791_v7 = vpop.eup %2790  ;;  %v2261_v51 = vadd.f32 -1.0, %v2789_v44  ;;  %2796 = vpow2.f32 %v1115_v43  ;;  %v1117_v21 = vmul.f32 1.442695, %v1056_v38  ;;  %v1292_v10 = vpack.c.bf16 %v1270_v25, %v1269_v26  ;;  %v3726_v15 = vld [vmem:[%s4075_s5 + $0x2] ss:$0 sm:$0xff] }
 0x231   : > { %v1181_v55 = vmul.f32 1.6732632, %v2263_v47  ;;  %v2264_v58 = vadd.f32 -1.0, %v2791_v7  ;;  %2798 = vpow2.f32 %v1121_v2  ;;  %vm1213_vm9 = vcmp.gt.f32.partialorder %v3628_v29, 0.0 }
 0x232   : > { %2800 = vpow2.f32 %v1117_v21  ;;  %v1293_v4 = vpack.c.bf16 %v1272_v48, %v1271_v60  ;;  %v1294_v18 = vpack.c.bf16 %v1274_v6, %v1273_v32  ;;  %v1179_v59 = vmul.f32 1.6732632, %v2261_v51  ;;  %2529 = vmatmul.mubr.bf16.gmra.mrb[48].mxu0 %v1292_v10 }
 0x233   : > { %v1245_v23 = vsel %vm1213_vm9, %v3628_v29, %v1181_v55  ;;  %v1182_v14 = vmul.f32 1.6732632, %v2264_v58  ;;  %vm1214_vm10 = vcmp.gt.f32.partialorder %v3640_v50, 0.0  ;;  %vm1211_vm11 = vcmp.gt.f32.partialorder %v3631_v45, 0.0 }
 0x234   : > { %v2793_v61 = vpop.eup %2792  ;;  %2532 = vmatprep.mubr.bf16.mxu0 %v1293_v4  ;;  %v1277_v20 = vmul.f32 1.050701, %v1245_v23  ;;  %v1243_v3 = vsel %vm1211_vm11, %v3631_v45, %v1179_v59  ;;  %vm1212_vm12 = vcmp.gt.f32.partialorder %v3650_v13, 0.0  ;;  %vm1217_vm13 = vcmp.gt.f32.partialorder %v3668_v63, 0.0 }
 0x235   : > { %v1246_v27 = vsel %vm1214_vm10, %v3640_v50, %v1182_v14  ;;  %v2262_v35 = vadd.f32 -1.0, %v2793_v61  ;;  %v1275_v34 = vmul.f32 1.050701, %v1243_v3  ;;  %vm1215_vm14 = vcmp.gt.f32.partialorder %v3671_v53, 0.0 }
 0x236   : > { %v1278_v1 = vmul.f32 1.050701, %v1246_v27  ;;  %vm1218_vm15 = vcmp.gt.f32.partialorder %v3677_v31, 0.0  ;;  %vm1216_vm0 = vcmp.gt.f32.partialorder %v3680_v17, 0.0 }
 0x237   : > { %v1180_v30 = vmul.f32 1.6732632, %v2262_v35 }
 0x238   : > { %v1296_v29 = vpack.c.bf16 %v1278_v1, %v1277_v20 }
 0x239   : > { %v2795_v24 = vpop.eup %2794  ;;  %v1244_v57 = vsel %vm1212_vm12, %v3650_v13, %v1180_v30 }
 0x23a   : > { %v2797_v11 = vpop.eup %2796  ;;  %v1276_v52 = vmul.f32 1.050701, %v1244_v57  ;;  %v2267_v41 = vadd.f32 -1.0, %v2795_v24  ;;  %2533 = vmatmul.mubr.bf16.gmra.mrb[52].mxu0 %v1294_v18 }
 0x23b   : > { %v2799_v9 = vpop.eup %2798  ;;  %v2265_v50 = vadd.f32 -1.0, %v2797_v11 }
 0x23c   : > { %v2801_v12 = vpop.eup %2800  ;;  %v1185_v8 = vmul.f32 1.6732632, %v2267_v41  ;;  %v2268_v49 = vadd.f32 -1.0, %v2799_v9  ;;  %v1295_v54 = vpack.c.bf16 %v1276_v52, %v1275_v34 }
 0x23d   : > { %v1183_v45 = vmul.f32 1.6732632, %v2265_v50  ;;  %v2266_v62 = vadd.f32 -1.0, %v2801_v12 }
 0x23e   : > { %v1249_v22 = vsel %vm1217_vm13, %v3668_v63, %v1185_v8  ;;  %v1186_v13 = vmul.f32 1.6732632, %v2268_v49  ;;  %2536 = vmatprep.mubr.bf16.mxu0 %v1295_v54 }
 0x23f   : > { %v1247_v42 = vsel %vm1215_vm14, %v3671_v53, %v1183_v45  ;;  %v1184_v5 = vmul.f32 1.6732632, %v2266_v62  ;;  %v1281_v46 = vmul.f32 1.050701, %v1249_v22  ;;  %v2670_v53 = vld [vmem:[%s4074_s4 + $0x20] sm:$0xff]  }
 0x240   : > { %v1250_v26 = vsel %vm1218_vm15, %v3677_v31, %v1186_v13  ;;  %v1279_v16 = vmul.f32 1.050701, %v1247_v42  ;;  %2596 = vmatprep.subr.bf16.mxu1 %v2670_v53  ;;  %2552 = vmatprep.subr.bf16.mxu0 %v2670_v53  ;;  %v2671_v31 = vld [vmem:[%s4074_s4 + $0x28] sm:$0xff]  }
 0x241   : > { %v1282_v25 = vmul.f32 1.050701, %v1250_v26  ;;  %v1248_v28 = vsel %vm1216_vm0, %v3680_v17, %v1184_v5  ;;  %2604 = vmatpush3.bf16.msra.mxu1 %v2670_v53  ;;  %2553 = vmatpush3.bf16.msra.mxu0 %v2670_v53  ;;  %v2672_v17 = vld [vmem:[%s4074_s4 + $0x30] sm:$0xff]  }
 0x242   : > { %v1280_v33 = vmul.f32 1.050701, %v1248_v28  ;;  %2537 = vmatmul.mubr.bf16.gmra.mrb[56].mxu0 %v1296_v29  ;;  %2597 = vmatprep.subr.bf16.mxu1 %v2671_v31 }
 0x243   : > { %v1298_v63 = vpack.c.bf16 %v1282_v25, %v1281_v46  ;;  %2554 = vmatprep.subr.bf16.mxu0 %v2671_v31 }
 0x244   : > { %v1297_v32 = vpack.c.bf16 %v1280_v33, %v1279_v16 }
 0x245   : > { %2605 = vmatpush3.bf16.msra.mxu1 %v2671_v31  ;;  %2555 = vmatpush3.bf16.msra.mxu0 %v2671_v31 }
 0x246   : > { %2540 = vmatprep.mubr.bf16.mxu0 %v1297_v32  ;;  %2598 = vmatprep.subr.bf16.mxu1 %v2672_v17 }
 0x247   : > { %2556 = vmatprep.subr.bf16.mxu0 %v2672_v17 }
 0x249   : > { %2606 = vmatpush3.bf16.msra.mxu1 %v2672_v17  ;;  %2557 = vmatpush3.bf16.msra.mxu0 %v2672_v17 }
 0x24a   : > { %2541 = vmatmul.mubr.bf16.gmra.mrb[60].mxu0 %v1298_v63  ;;  %2558 = vmatprep.subr.bf16.mxu0 %v2673_v19 }
 0x24b   : > { %2599 = vmatprep.subr.bf16.mxu1 %v2673_v19 }
 0x24d   : > { %2559 = vmatpush3.bf16.msra.mxu0 %v2673_v19  ;;  %2607 = vmatpush3.bf16.msra.mxu1 %v2673_v19 }
 0x2db   : > { %v2514_v36 = vpop.f32.mrb[32].mxu0 }
 0x2dc   : > { %v1411_v39 = vadd.f32 %v2514_v36, %v3726_v15  ;;  %v1402_v37 = vpop.f32.mrb[33].mxu0 }
 0x2dd   : > { %v3730_v38 = vadd.f32 %v3726_v15, %v1402_v37  ;;  %v2515_v40 = vpop.f32.mrb[34].mxu0 }
 0x2de   : > { %v1531_v60 = vmin.f32 %v1411_v39, 0.0  ;;  %v3733_v56 = vadd.f32 %v2515_v40, %v3726_v15  ;;  %v1405_v43 = vpop.f32.mrb[35].mxu0  ;;  %vm1691_vm1 = vcmp.gt.f32.partialorder %v1411_v39, 0.0 }
 0x2df   : > { %v1529_v2 = vmin.f32 %v3730_v38, 0.0  ;;  %v3737_v44 = vadd.f32 %v3726_v15, %v1405_v43  ;;  %vm1689_vm2 = vcmp.gt.f32.partialorder %v3730_v38, 0.0 }
 0x2e0   : > { %v1565_v6 = vmul.f32 1.442695, %v1531_v60  ;;  %v1532_v0 = vmin.f32 %v3733_v56, 0.0  ;;  %vm1692_vm3 = vcmp.gt.f32.partialorder %v3733_v56, 0.0 }
 0x2e1   : > { %v1561_v47 = vmul.f32 1.442695, %v1529_v2  ;;  %v1530_v7 = vmin.f32 %v3737_v44, 0.0  ;;  %vm1690_vm4 = vcmp.gt.f32.partialorder %v3737_v44, 0.0 }
 0x2e2   : > { %2802 = vpow2.f32 %v1565_v6  ;;  %v1567_v48 = vmul.f32 1.442695, %v1532_v0 }
 0x2e3   : > { %2804 = vpow2.f32 %v1561_v47  ;;  %v1563_v51 = vmul.f32 1.442695, %v1530_v7  ;;  %v2518_v21 = vpop.f32.mrb[36].mxu0 }
 0x2e4   : > { %2806 = vpow2.f32 %v1567_v48  ;;  %v3742_v55 = vadd.f32 %v2518_v21, %v3726_v15  ;;  %v1418_v58 = vpop.f32.mrb[37].mxu0 }
 0x2e5   : > { %2808 = vpow2.f32 %v1563_v51  ;;  %v3745_v10 = vadd.f32 %v3726_v15, %v1418_v58  ;;  %v2519_v4 = vpop.f32.mrb[38].mxu0 }
 0x2e6   : > { %v1535_v18 = vmin.f32 %v3742_v55, 0.0  ;;  %v3749_v23 = vadd.f32 %v2519_v4, %v3726_v15  ;;  %v1421_v59 = vpop.f32.mrb[39].mxu0  ;;  %vm1695_vm5 = vcmp.gt.f32.partialorder %v3742_v55, 0.0 }
 0x2e7   : > { %v1533_v14 = vmin.f32 %v3745_v10, 0.0  ;;  %v3753_v61 = vadd.f32 %v3726_v15, %v1421_v59  ;;  %vm1693_vm6 = vcmp.gt.f32.partialorder %v3745_v10, 0.0 }
 0x2e8   : > { %v1573_v27 = vmul.f32 1.442695, %v1535_v18  ;;  %v1536_v35 = vmin.f32 %v3749_v23, 0.0  ;;  %vm1696_vm7 = vcmp.gt.f32.partialorder %v3749_v23, 0.0 }
 0x2e9   : > { %v1569_v20 = vmul.f32 1.442695, %v1533_v14  ;;  %v1534_v1 = vmin.f32 %v3753_v61, 0.0  ;;  %vm1694_vm8 = vcmp.gt.f32.partialorder %v3753_v61, 0.0 }
 0x2ea   : > { %2810 = vpow2.f32 %v1573_v27  ;;  %v1575_v3 = vmul.f32 1.442695, %v1536_v35 }
 0x2eb   : > { %2812 = vpow2.f32 %v1569_v20  ;;  %v1571_v30 = vmul.f32 1.442695, %v1534_v1 }
 0x2ec   : > { %v2522_v29 = vpop.f32.mrb[40].mxu0  ;;  %v2803_v24 = vpop.eup %2802  ;;  %2814 = vpow2.f32 %v1575_v3 }
 0x2ed   : > { %v3758_v57 = vadd.f32 %v2522_v29, %v3726_v15  ;;  %v1434_v11 = vpop.f32.mrb[41].mxu0  ;;  %v2805_v34 = vpop.eup %2804  ;;  %v2280_v52 = vadd.f32 -1.0, %v2803_v24  ;;  %2816 = vpow2.f32 %v1571_v30 }
 0x2ee   : > { %v3761_v41 = vadd.f32 %v3726_v15, %v1434_v11  ;;  %v2523_v9 = vpop.f32.mrb[42].mxu0  ;;  %v2807_v50 = vpop.eup %2806  ;;  %v2278_v12 = vadd.f32 -1.0, %v2805_v34 }
 0x2ef   : > { %v1539_v8 = vmin.f32 %v3758_v57, 0.0  ;;  %v3765_v49 = vadd.f32 %v2523_v9, %v3726_v15  ;;  %v1437_v54 = vpop.f32.mrb[43].mxu0  ;;  %v2809_v45 = vpop.eup %2808  ;;  %v1659_v62 = vmul.f32 1.6732632, %v2280_v52  ;;  %v2281_v22 = vadd.f32 -1.0, %v2807_v50 }
 0x2f0   : > { %v1537_v13 = vmin.f32 %v3761_v41, 0.0  ;;  %v1657_v42 = vmul.f32 1.6732632, %v2278_v12  ;;  %v2279_v5 = vadd.f32 -1.0, %v2809_v45  ;;  %vm1699_vm9 = vcmp.gt.f32.partialorder %v3758_v57, 0.0 }
 0x2f1   : > { %v1581_v26 = vmul.f32 1.442695, %v1539_v8  ;;  %v1540_v46 = vmin.f32 %v3765_v49, 0.0  ;;  %v1723_v25 = vsel %vm1691_vm1, %v1411_v39, %v1659_v62  ;;  %v1660_v28 = vmul.f32 1.6732632, %v2281_v22 }
 0x2f2   : > { %v1721_v16 = vsel %vm1689_vm2, %v3730_v38, %v1657_v42  ;;  %v1658_v33 = vmul.f32 1.6732632, %v2279_v5  ;;  %v1577_v32 = vmul.f32 1.442695, %v1537_v13  ;;  %v1755_v17 = vmul.f32 1.050701, %v1723_v25 }
 0x2f3   : > { %2818 = vpow2.f32 %v1581_v26  ;;  %v1724_v63 = vsel %vm1692_vm3, %v3733_v56, %v1660_v28  ;;  %v1583_v53 = vmul.f32 1.442695, %v1540_v46  ;;  %v3776_v39 = vadd.f32 %v3726_v15, %v1437_v54 }
 0x2f4   : > { %v2811_v31 = vpop.eup %2810  ;;  %v1756_v19 = vmul.f32 1.050701, %v1724_v63  ;;  %v1722_v36 = vsel %vm1690_vm4, %v3737_v44, %v1658_v33  ;;  %v1753_v38 = vmul.f32 1.050701, %v1721_v16  ;;  %vm1700_vm10 = vcmp.gt.f32.partialorder %v3765_v49, 0.0 }
 0x2f5   : > { %v2813_v37 = vpop.eup %2812  ;;  %v1754_v40 = vmul.f32 1.050701, %v1722_v36  ;;  %v2284_v60 = vadd.f32 -1.0, %v2811_v31  ;;  %2820 = vpow2.f32 %v1583_v53  ;;  %v1538_v6 = vmin.f32 %v3776_v39, 0.0 }
 0x2f6   : > { %v2815_v43 = vpop.eup %2814  ;;  %v1786_v2 = vpack.c.bf16 %v1756_v19, %v1755_v17  ;;  %v2282_v56 = vadd.f32 -1.0, %v2813_v37  ;;  %2822 = vpow2.f32 %v1577_v32  ;;  %vm1698_vm11 = vcmp.gt.f32.partialorder %v3776_v39, 0.0 }
 0x2f7   : > { %v2817_v0 = vpop.eup %2816  ;;  %v1663_v47 = vmul.f32 1.6732632, %v2284_v60  ;;  %v2285_v7 = vadd.f32 -1.0, %v2815_v43  ;;  %v1785_v48 = vpack.c.bf16 %v1754_v40, %v1753_v38  ;;  %v1579_v21 = vmul.f32 1.442695, %v1538_v6 }
 0x2f8   : > { %v1661_v44 = vmul.f32 1.6732632, %v2282_v56  ;;  %v2283_v51 = vadd.f32 -1.0, %v2817_v0  ;;  %vm1697_vm12 = vcmp.gt.f32.partialorder %v3761_v41, 0.0 }
 0x2f9   : > { %v1727_v58 = vsel %vm1695_vm5, %v3742_v55, %v1663_v47  ;;  %v1664_v4 = vmul.f32 1.6732632, %v2285_v7  ;;  %2560 = vmatprep.mubr.bf16.mxu0 %v1785_v48  ;;  %2824 = vpow2.f32 %v1579_v21 }
 0x2fa   : > { %v1662_v59 = vmul.f32 1.6732632, %v2283_v51  ;;  %2561 = vmatmul.mubr.bf16.vlgmr.msra.gmra.mrb[64].mxu0 %v1786_v2  ;;  %v1725_v27 = vsel %vm1693_vm6, %v3745_v10, %v1661_v44  ;;  %v1759_v30 = vmul.f32 1.050701, %v1727_v58 }
 0x2fb   : > { %v2526_v18 = vpop.f32.mrb[44].mxu0  ;;  %v1728_v35 = vsel %vm1696_vm7, %v3749_v23, %v1664_v4  ;;  %v1757_v9 = vmul.f32 1.050701, %v1725_v27 }
 0x2fc   : > { %v1450_v14 = vpop.f32.mrb[45].mxu0  ;;  %v3787_v20 = vadd.f32 %v2526_v18, %v3726_v15  ;;  %v1760_v29 = vmul.f32 1.050701, %v1728_v35  ;;  %v1726_v24 = vsel %vm1694_vm8, %v3753_v61, %v1662_v59 }
 0x2fd   : > { %v3790_v55 = vadd.f32 %v3726_v15, %v1450_v14  ;;  %v2527_v1 = vpop.f32.mrb[46].mxu0  ;;  %v2819_v3 = vpop.eup %2818  ;;  %v1758_v52 = vmul.f32 1.050701, %v1726_v24 }
 0x2fe   : > { %v3794_v11 = vadd.f32 %v2527_v1, %v3726_v15  ;;  %v1453_v34 = vpop.f32.mrb[47].mxu0  ;;  %v2288_v10 = vadd.f32 -1.0, %v2819_v3  ;;  %v1543_v23 = vmin.f32 %v3787_v20, 0.0  ;;  %v1788_v50 = vpack.c.bf16 %v1760_v29, %v1759_v30 }
 0x2ff   : > { %v1541_v12 = vmin.f32 %v3790_v55, 0.0  ;;  %v2821_v8 = vpop.eup %2820  ;;  %v3800_v61 = vadd.f32 %v3726_v15, %v1453_v34  ;;  %v1787_v26 = vpack.c.bf16 %v1758_v52, %v1757_v9  ;;  %vm1703_vm13 = vcmp.gt.f32.partialorder %v3787_v20, 0.0 }
 0x300   : > { %v1667_v54 = vmul.f32 1.6732632, %v2288_v10  ;;  %v1589_v45 = vmul.f32 1.442695, %v1543_v23  ;;  %v1544_v62 = vmin.f32 %v3794_v11, 0.0  ;;  %v2289_v22 = vadd.f32 -1.0, %v2821_v8  ;;  %v2823_v42 = vpop.eup %2822 }
 0x301   : > { %v1585_v13 = vmul.f32 1.442695, %v1541_v12  ;;  %v1542_v16 = vmin.f32 %v3800_v61, 0.0  ;;  %2564 = vmatprep.mubr.bf16.mxu1 %v1787_v26  ;;  %v2286_v32 = vadd.f32 -1.0, %v2823_v42  ;;  %vm1701_vm14 = vcmp.gt.f32.partialorder %v3790_v55, 0.0 }
 0x302   : > { %2826 = vpow2.f32 %v1589_v45  ;;  %v1591_v5 = vmul.f32 1.442695, %v1544_v62  ;;  %v1668_v46 = vmul.f32 1.6732632, %v2289_v22  ;;  %v1731_v28 = vsel %vm1699_vm9, %v3758_v57, %v1667_v54  ;;  %2565 = vmatmul.mubr.bf16.vlgmr.msra.gmra.mrb[32].mxu1 %v1788_v50 }
 0x303   : > { %2828 = vpow2.f32 %v1585_v13  ;;  %v2825_v63 = vpop.eup %2824  ;;  %v1587_v37 = vmul.f32 1.442695, %v1542_v16  ;;  %v3818_v60 = vmul.f32 1.050701, %v1731_v28  ;;  %v1665_v48 = vmul.f32 1.6732632, %v2286_v32 }
 0x304   : > { %2830 = vpow2.f32 %v1591_v5  ;;  %v1732_v53 = vsel %vm1700_vm10, %v3765_v49, %v1668_v46  ;;  %v2287_v36 = vadd.f32 -1.0, %v2825_v63  ;;  %vm1704_vm15 = vcmp.gt.f32.partialorder %v3794_v11, 0.0 }
 0x305   : > { %v2530_v25 = vpop.f32.mrb[48].mxu0  ;;  %v3813_v57 = vmul.f32 1.050701, %v1732_v53  ;;  %2832 = vpow2.f32 %v1587_v37  ;;  %v1729_v29 = vsel %vm1697_vm12, %v3761_v41, %v1665_v48  ;;  %vm1702_vm0 = vcmp.gt.f32.partialorder %v3800_v61, 0.0 }
 0x306   : > { %v1466_v33 = vpop.f32.mrb[49].mxu0  ;;  %v3808_v31 = vadd.f32 %v2530_v25, %v3726_v15  ;;  %v1666_v2 = vmul.f32 1.6732632, %v2287_v36  ;;  %v1761_v54 = vmul.f32 1.050701, %v1729_v29 }
 0x307   : > { %v3811_v17 = vadd.f32 %v3726_v15, %v1466_v33  ;;  %v2531_v19 = vpop.f32.mrb[50].mxu0  ;;  %v1790_v7 = vpack.c.bf16 %v3813_v57, %v3818_v60 }
 0x308   : > { %v3816_v38 = vadd.f32 %v2531_v19, %v3726_v15  ;;  %v1469_v40 = vpop.f32.mrb[51].mxu0  ;;  %v1547_v49 = vmin.f32 %v3808_v31, 0.0  ;;  %v1730_v4 = vsel %vm1698_vm11, %v3776_v39, %v1666_v2  ;;  %vm1707_vm1 = vcmp.gt.f32.partialorder %v3808_v31, 0.0 }
 0x309   : > { %v1545_v43 = vmin.f32 %v3811_v17, 0.0  ;;  %v3824_v47 = vadd.f32 %v3726_v15, %v1469_v40  ;;  %v1762_v9 = vmul.f32 1.050701, %v1730_v4  ;;  %vm1705_vm2 = vcmp.gt.f32.partialorder %v3811_v17, 0.0 }
 0x30a   : > { %v1548_v56 = vmin.f32 %v3816_v38, 0.0  ;;  %v1597_v6 = vmul.f32 1.442695, %v1547_v49  ;;  %vm1708_vm3 = vcmp.gt.f32.partialorder %v3816_v38, 0.0 }
 0x30b   : > { %v1593_v0 = vmul.f32 1.442695, %v1545_v43  ;;  %v1546_v51 = vmin.f32 %v3824_v47, 0.0  ;;  %v1789_v25 = vpack.c.bf16 %v1762_v9, %v1761_v54  ;;  %vm1706_vm4 = vcmp.gt.f32.partialorder %v3824_v47, 0.0 }
 0x30c   : > { %v1599_v44 = vmul.f32 1.442695, %v1548_v56  ;;  %2834 = vpow2.f32 %v1597_v6  ;;  %v2827_v58 = vpop.eup %2826 }
 0x30d   : > { %v2534_v21 = vpop.f32.mrb[52].mxu0  ;;  %2836 = vpow2.f32 %v1593_v0  ;;  %v2829_v14 = vpop.eup %2828  ;;  %v2292_v27 = vadd.f32 -1.0, %v2827_v58  ;;  %v1595_v35 = vmul.f32 1.442695, %v1546_v51  ;;  %2568 = vmatprep.mubr.bf16.mxu1 %v1789_v25 }
 0x30e   : > { %v3833_v18 = vadd.f32 %v2534_v21, %v3726_v15  ;;  %v1482_v59 = vpop.f32.mrb[53].mxu0  ;;  %2838 = vpow2.f32 %v1599_v44  ;;  %v2831_v30 = vpop.eup %2830  ;;  %v2290_v10 = vadd.f32 -1.0, %v2829_v14  ;;  %2569 = vmatmul.mubr.bf16.gmra.mrb[36].mxu1 %v1790_v7 }
 0x30f   : > { %v3836_v1 = vadd.f32 %v3726_v15, %v1482_v59  ;;  %v2535_v3 = vpop.f32.mrb[54].mxu0  ;;  %v1671_v52 = vmul.f32 1.6732632, %v2292_v27  ;;  %2840 = vpow2.f32 %v1595_v35  ;;  %v2293_v50 = vadd.f32 -1.0, %v2831_v30  ;;  %v2833_v45 = vpop.eup %2832 }
 0x310   : > { %v1551_v39 = vmin.f32 %v3833_v18, 0.0  ;;  %v3842_v24 = vadd.f32 %v2535_v3, %v3726_v15  ;;  %v1485_v34 = vpop.f32.mrb[55].mxu0  ;;  %v1669_v13 = vmul.f32 1.6732632, %v2290_v10  ;;  %v2291_v42 = vadd.f32 -1.0, %v2833_v45 }
 0x311   : > { %v1549_v23 = vmin.f32 %v3836_v1, 0.0  ;;  %v1735_v22 = vsel %vm1703_vm13, %v3787_v20, %v1671_v52  ;;  %v1672_v26 = vmul.f32 1.6732632, %v2293_v50  ;;  %v3854_v46 = vadd.f32 %v3726_v15, %v1485_v34 }
 0x312   : > { %v1605_v12 = vmul.f32 1.442695, %v1551_v39  ;;  %v1552_v8 = vmin.f32 %v3842_v24, 0.0  ;;  %v1670_v33 = vmul.f32 1.6732632, %v2291_v42  ;;  %v1733_v43 = vsel %vm1701_vm14, %v3790_v55, %v1669_v13 }
 0x313   : > { %v1601_v41 = vmul.f32 1.442695, %v1549_v23  ;;  %v1550_v36 = vmin.f32 %v3854_v46, 0.0  ;;  %v1767_v49 = vmul.f32 1.050701, %v1735_v22  ;;  %v1736_v6 = vsel %vm1704_vm15, %v3794_v11, %v1672_v26 }
 0x314   : > { %2842 = vpow2.f32 %v1605_v12  ;;  %v1607_v62 = vmul.f32 1.442695, %v1552_v8  ;;  %vm1711_vm5 = vcmp.gt.f32.partialorder %v3833_v18, 0.0  ;;  %v1734_v55 = vsel %vm1702_vm0, %v3800_v61, %v1670_v33 }
 0x315   : > { %2844 = vpow2.f32 %v1601_v41  ;;  %v2538_v5 = vpop.f32.mrb[56].mxu0  ;;  %v1603_v21 = vmul.f32 1.442695, %v1550_v36  ;;  %v1765_v59 = vmul.f32 1.050701, %v1733_v43  ;;  %vm1712_vm6 = vcmp.gt.f32.partialorder %v3842_v24, 0.0 }
 0x316   : > { %2846 = vpow2.f32 %v1607_v62  ;;  %v1498_v28 = vpop.f32.mrb[57].mxu0  ;;  %v2835_v16 = vpop.eup %2834  ;;  %v3858_v63 = vadd.f32 %v2538_v5, %v3726_v15  ;;  %v1766_v3 = vmul.f32 1.050701, %v1734_v55  ;;  %v1768_v34 = vmul.f32 1.050701, %v1736_v6 }
 0x317   : > { %v3861_v20 = vadd.f32 %v3726_v15, %v1498_v28  ;;  %v2539_v32 = vpop.f32.mrb[58].mxu0  ;;  %v2837_v53 = vpop.eup %2836  ;;  %v2296_v19 = vadd.f32 -1.0, %v2835_v16  ;;  %2848 = vpow2.f32 %v1603_v21  ;;  %vm1709_vm7 = vcmp.gt.f32.partialorder %v3836_v1, 0.0 }
 0x318   : > { %v1501_v37 = vpop.f32.mrb[59].mxu0  ;;  %v2839_v40 = vpop.eup %2838  ;;  %v2294_v2 = vadd.f32 -1.0, %v2837_v53  ;;  %v1555_v56 = vmin.f32 %v3858_v63, 0.0  ;;  %v3882_v60 = vadd.f32 %v2539_v32, %v3726_v15  ;;  %v1791_v26 = vpack.c.bf16 %v1766_v3, %v1765_v59 }
 0x319   : > { %v1675_v0 = vmul.f32 1.6732632, %v2296_v19  ;;  %v2297_v48 = vadd.f32 -1.0, %v2839_v40  ;;  %v1553_v44 = vmin.f32 %v3861_v20, 0.0  ;;  %v2841_v51 = vpop.eup %2840  ;;  %v3885_v11 = vadd.f32 %v3726_v15, %v1501_v37 }
 0x31a   : > { %v1613_v57 = vmul.f32 1.442695, %v1555_v56  ;;  %v1673_v7 = vmul.f32 1.6732632, %v2294_v2  ;;  %v2295_v58 = vadd.f32 -1.0, %v2841_v51  ;;  %v1556_v10 = vmin.f32 %v3882_v60, 0.0  ;;  %2572 = vmatprep.mubr.bf16.mxu1 %v1791_v26 }
 0x31b   : > { %v1609_v4 = vmul.f32 1.442695, %v1553_v44  ;;  %v1739_v14 = vsel %vm1707_vm1, %v3808_v31, %v1675_v0  ;;  %v1676_v27 = vmul.f32 1.6732632, %v2297_v48  ;;  %v1554_v8 = vmin.f32 %v3885_v11, 0.0 }
 0x31c   : > { %v1674_v30 = vmul.f32 1.6732632, %v2295_v58  ;;  %2850 = vpow2.f32 %v1613_v57  ;;  %v1771_v50 = vmul.f32 1.050701, %v1739_v14  ;;  %v1737_v31 = vsel %vm1705_vm2, %v3811_v17, %v1673_v7 }
 0x31d   : > { %v2542_v35 = vpop.f32.mrb[60].mxu0  ;;  %2852 = vpow2.f32 %v1609_v4  ;;  %v1740_v41 = vsel %vm1708_vm3, %v3816_v38, %v1676_v27  ;;  %v1615_v42 = vmul.f32 1.442695, %v1556_v10  ;;  %v1611_v5 = vmul.f32 1.442695, %v1554_v8 }
 0x31e   : > { %v2843_v61 = vpop.eup %2842  ;;  %v1514_v29 = vpop.f32.mrb[61].mxu0  ;;  %v1738_v12 = vsel %vm1706_vm4, %v3824_v47, %v1674_v30  ;;  %v1792_v47 = vpack.c.bf16 %v1768_v34, %v1767_v49  ;;  %v3906_v28 = vadd.f32 %v2542_v35, %v3726_v15  ;;  %v1769_v16 = vmul.f32 1.050701, %v1737_v31 }
 0x31f   : > { %v2845_v39 = vpop.eup %2844  ;;  %v2300_v52 = vadd.f32 -1.0, %v2843_v61  ;;  %v2543_v23 = vpop.f32.mrb[62].mxu0  ;;  %v1770_v13 = vmul.f32 1.050701, %v1738_v12  ;;  %v1772_v33 = vmul.f32 1.050701, %v1740_v41  ;;  %2854 = vpow2.f32 %v1615_v42 }
 0x320   : > { %v2847_v9 = vpop.eup %2846  ;;  %v1517_v54 = vpop.f32.mrb[63].mxu0  ;;  %v2298_v62 = vadd.f32 -1.0, %v2845_v39  ;;  %v3909_v38 = vadd.f32 %v3726_v15, %v1514_v29  ;;  %2856 = vpow2.f32 %v1611_v5  ;;  %2573 = vmatmul.mubr.bf16.gmra.mrb[40].mxu1 %v1792_v47  ;;  %v3918_v43 = vadd.f32 %v2543_v23, %v3726_v15 }
 0x321   : > { %v1679_v45 = vmul.f32 1.6732632, %v2300_v52  ;;  %v2301_v22 = vadd.f32 -1.0, %v2847_v9  ;;  %v2849_v40 = vpop.eup %2848  ;;  %v3921_v2 = vadd.f32 %v3726_v15, %v1517_v54  ;;  %v1793_v56 = vpack.c.bf16 %v1770_v13, %v1769_v16 }
 0x322   : > { %v1677_v32 = vmul.f32 1.6732632, %v2298_v62  ;;  %v1557_v37 = vmin.f32 %v3909_v38, 0.0  ;;  %v2299_v6 = vadd.f32 -1.0, %v2849_v40  ;;  %v1794_v48 = vpack.c.bf16 %v1772_v33, %v1771_v50 }
 0x323   : > { %v1743_v17 = vsel %vm1711_vm5, %v3833_v18, %v1679_v45  ;;  %v1680_v25 = vmul.f32 1.6732632, %v2301_v22  ;;  %v1559_v18 = vmin.f32 %v3906_v28, 0.0  ;;  %v1560_v57 = vmin.f32 %v3918_v43, 0.0  ;;  %2576 = vmatprep.mubr.bf16.mxu1 %v1793_v56 }
 0x324   : > { %v1775_v19 = vmul.f32 1.050701, %v1743_v17  ;;  %v1617_v0 = vmul.f32 1.442695, %v1557_v37  ;;  %v1741_v55 = vsel %vm1709_vm7, %v3836_v1, %v1677_v32  ;;  %v1678_v7 = vmul.f32 1.6732632, %v2299_v6 }
 0x325   : > { %v1744_v53 = vsel %vm1712_vm6, %v3842_v24, %v1680_v25  ;;  %v1621_v49 = vmul.f32 1.442695, %v1559_v18  ;;  %v1558_v15 = vmin.f32 %v3921_v2, 0.0  ;;  %vm1710_vm8 = vcmp.gt.f32.partialorder %v3854_v46, 0.0 }
 0x326   : > { %v1776_v36 = vmul.f32 1.050701, %v1744_v53  ;;  %v2851_v24 = vpop.eup %2850  ;;  %v1623_v4 = vmul.f32 1.442695, %v1560_v57  ;;  %v1742_v59 = vsel %vm1710_vm8, %v3854_v46, %v1678_v7  ;;  %v1773_v27 = vmul.f32 1.050701, %v1741_v55 }
 0x327   : > { %v2853_v51 = vpop.eup %2852  ;;  %v2304_v21 = vadd.f32 -1.0, %v2851_v24  ;;  %2858 = vpow2.f32 %v1621_v49  ;;  %v1619_v14 = vmul.f32 1.442695, %v1558_v15  ;;  %v1774_v35 = vmul.f32 1.050701, %v1742_v59 }
 0x328   : > { %v1796_v44 = vpack.c.bf16 %v1776_v36, %v1775_v19  ;;  %v2302_v58 = vadd.f32 -1.0, %v2853_v51  ;;  %2860 = vpow2.f32 %v1617_v0  ;;  %2577 = vmatmul.mubr.bf16.gmra.mrb[44].mxu1 %v1794_v48  ;;  %vm1715_vm9 = vcmp.gt.f32.partialorder %v3858_v63, 0.0 }
 0x329   : > { %v1683_v61 = vmul.f32 1.6732632, %v2304_v21  ;;  %2862 = vpow2.f32 %v1623_v4  ;;  %v2855_v1 = vpop.eup %2854  ;;  %v1795_v39 = vpack.c.bf16 %v1774_v35, %v1773_v27  ;;  %vm1713_vm10 = vcmp.gt.f32.partialorder %v3861_v20, 0.0 }
 0x32a   : > { %v1681_v3 = vmul.f32 1.6732632, %v2302_v58  ;;  %2864 = vpow2.f32 %v1619_v14  ;;  %v2857_v30 = vpop.eup %2856  ;;  %v2305_v29 = vadd.f32 -1.0, %v2855_v1  ;;  %vm1716_vm11 = vcmp.gt.f32.partialorder %v3882_v60, 0.0 }
 0x32b   : > { %v2303_v34 = vadd.f32 -1.0, %v2857_v30  ;;  %v1747_v52 = vsel %vm1715_vm9, %v3858_v63, %v1683_v61  ;;  %2580 = vmatprep.mubr.bf16.mxu1 %v1795_v39  ;;  %vm1714_vm12 = vcmp.gt.f32.partialorder %v3885_v11, 0.0  ;;  %vm1719_vm13 = vcmp.gt.f32.partialorder %v3906_v28, 0.0 }
 0x32c   : > { %v1684_v46 = vmul.f32 1.6732632, %v2305_v29  ;;  %v1745_v10 = vsel %vm1713_vm10, %v3861_v20, %v1681_v3  ;;  %v1779_v12 = vmul.f32 1.050701, %v1747_v52  ;;  %vm1717_vm14 = vcmp.gt.f32.partialorder %v3909_v38, 0.0 }
 0x32d   : > { %v1682_v23 = vmul.f32 1.6732632, %v2303_v34  ;;  %v1777_v41 = vmul.f32 1.050701, %v1745_v10  ;;  %vm1720_vm15 = vcmp.gt.f32.partialorder %v3918_v43, 0.0  ;;  %vm1718_vm0 = vcmp.gt.f32.partialorder %v3921_v2, 0.0 }
 0x32e   : > { %v1748_v50 = vsel %vm1716_vm11, %v3882_v60, %v1684_v46 }
 0x32f   : > { %v1780_v8 = vmul.f32 1.050701, %v1748_v50  ;;  %v1746_v54 = vsel %vm1714_vm12, %v3885_v11, %v1682_v23 }
 0x330   : > { %v1778_v45 = vmul.f32 1.050701, %v1746_v54  ;;  %2581 = vmatmul.mubr.bf16.gmra.mrb[48].mxu1 %v1796_v44 }
 0x331   : > { %v2859_v9 = vpop.eup %2858  ;;  %v1798_v20 = vpack.c.bf16 %v1780_v8, %v1779_v12 }
 0x332   : > { %v2861_v31 = vpop.eup %2860  ;;  %v2308_v63 = vadd.f32 -1.0, %v2859_v9  ;;  %v1797_v5 = vpack.c.bf16 %v1778_v45, %v1777_v41 }
 0x333   : > { %v2306_v62 = vadd.f32 -1.0, %v2861_v31  ;;  %v2863_v13 = vpop.eup %2862 }
 0x334   : > { %v1687_v22 = vmul.f32 1.6732632, %v2308_v63  ;;  %v2865_v26 = vpop.eup %2864  ;;  %v2309_v17 = vadd.f32 -1.0, %v2863_v13  ;;  %2584 = vmatprep.mubr.bf16.mxu1 %v1797_v5 }
 0x335   : > { %v1685_v42 = vmul.f32 1.6732632, %v2306_v62  ;;  %v2307_v60 = vadd.f32 -1.0, %v2865_v26 }
 0x336   : > { %v1751_v25 = vsel %vm1719_vm13, %v3906_v28, %v1687_v22  ;;  %v1688_v11 = vmul.f32 1.6732632, %v2309_v17 }
 0x337   : > { %v1749_v47 = vsel %vm1717_vm14, %v3909_v38, %v1685_v42  ;;  %v1686_v16 = vmul.f32 1.6732632, %v2307_v60  ;;  %v1783_v32 = vmul.f32 1.050701, %v1751_v25  ;;  %v3947_v38 = vld [vmem:[%s4075_s5 + $0x3] ss:$0 sm:$0xff] }
 0x338   : > { %v1752_v33 = vsel %vm1720_vm15, %v3918_v43, %v1688_v11  ;;  %2585 = vmatmul.mubr.bf16.gmra.mrb[52].mxu1 %v1798_v20  ;;  %v1781_v19 = vmul.f32 1.050701, %v1749_v47 }
 0x339   : > { %v1784_v53 = vmul.f32 1.050701, %v1752_v33  ;;  %v1750_v18 = vsel %vm1718_vm0, %v3921_v2, %v1686_v16 }
 0x33a   : > { %v1782_v36 = vmul.f32 1.050701, %v1750_v18 }
 0x33b   : > { %v1800_v28 = vpack.c.bf16 %v1784_v53, %v1783_v32 }
 0x33c   : > { %v1799_v37 = vpack.c.bf16 %v1782_v36, %v1781_v19 }
 0x33e   : > { %2588 = vmatprep.mubr.bf16.mxu1 %v1799_v37 }
 0x340   : > { %2589 = vmatmul.mubr.bf16.gmra.mrb[56].mxu1 %v1800_v28 }
 0x3cd   : > { %v2562_v40 = vpop.f32.mrb[64].mxu0 }
 0x3ce   : > { %v1913_v49 = vadd.f32 %v2562_v40, %v3947_v38  ;;  %v1904_v43 = vpop.f32.mrb[65].mxu0 }
 0x3cf   : > { %v1905_v2 = vadd.f32 %v3947_v38, %v1904_v43  ;;  %v2563_v56 = vpop.f32.mrb[66].mxu0 }
 0x3d0   : > { %2866 = vtanh.f32 %v1913_v49  ;;  %v1916_v24 = vadd.f32 %v2563_v56, %v3947_v38  ;;  %v1907_v6 = vpop.f32.mrb[67].mxu0 }
 0x3d1   : > { %2868 = vtanh.f32 %v1905_v2  ;;  %v1908_v0 = vadd.f32 %v3947_v38, %v1907_v6 }
 0x3d2   : > { %2870 = vtanh.f32 %v1916_v24 }
 0x3d3   : > { %2872 = vtanh.f32 %v1908_v0 }
 0x3d5   : > { %v2566_v48 = vpop.f32.mrb[32].mxu1 }
 0x3d6   : > { %v1929_v44 = vadd.f32 %v2566_v48, %v3947_v38  ;;  %v1920_v51 = vpop.f32.mrb[33].mxu1 }
 0x3d7   : > { %v1921_v55 = vadd.f32 %v3947_v38, %v1920_v51  ;;  %v2567_v21 = vpop.f32.mrb[34].mxu1 }
 0x3d8   : > { %2874 = vtanh.f32 %v1929_v44  ;;  %v1932_v7 = vadd.f32 %v2567_v21, %v3947_v38  ;;  %v1923_v58 = vpop.f32.mrb[35].mxu1 }
 0x3d9   : > { %2876 = vtanh.f32 %v1921_v55  ;;  %v1924_v4 = vadd.f32 %v3947_v38, %v1923_v58 }
 0x3da   : > { %v2867_v57 = vpop.eup %2866  ;;  %2878 = vtanh.f32 %v1932_v7 }
 0x3db   : > { %v2869_v15 = vpop.eup %2868  ;;  %2065 = vst [vmem:[%s3959_s14 + $0x10] sm:$0xff] %v2867_v57  ;;  %2880 = vtanh.f32 %v1924_v4 }
 0x3dc   : > { %v2871_v59 = vpop.eup %2870  ;;  %2063 = vst [vmem:[%s3959_s14] sm:$0xff] %v2869_v15 }
 0x3dd   : > { %v2873_v14 = vpop.eup %2872  ;;  %2066 = vst [vmem:[%s3959_s14 + $0x18] sm:$0xff] %v2871_v59 }
 0x3de   : > { %2064 = vst [vmem:[%s3959_s14 + $0x8] sm:$0xff] %v2873_v14 }
 0x3e1   : > { %v2570_v3 = vpop.f32.mrb[36].mxu1 }
 0x3e2   : > { %v2875_v27 = vpop.eup %2874  ;;  %v1945_v30 = vadd.f32 %v2570_v3, %v3947_v38  ;;  %v1936_v29 = vpop.f32.mrb[37].mxu1 }
 0x3e3   : > { %v2877_v35 = vpop.eup %2876  ;;  %2069 = vst [vmem:[%s3959_s14 + $0x30] sm:$0xff] %v2875_v27  ;;  %v1937_v39 = vadd.f32 %v3947_v38, %v1936_v29  ;;  %v2571_v34 = vpop.f32.mrb[38].mxu1 }
 0x3e4   : > { %v2879_v61 = vpop.eup %2878  ;;  %2067 = vst [vmem:[%s3959_s14 + $0x20] sm:$0xff] %v2877_v35  ;;  %2882 = vtanh.f32 %v1945_v30  ;;  %v1948_v52 = vadd.f32 %v2571_v34, %v3947_v38  ;;  %v1939_v46 = vpop.f32.mrb[39].mxu1 }
 0x3e5   : > { %v2881_v1 = vpop.eup %2880  ;;  %2070 = vst [vmem:[%s3959_s14 + $0x38] sm:$0xff] %v2879_v61  ;;  %2884 = vtanh.f32 %v1937_v39  ;;  %v1940_v10 = vadd.f32 %v3947_v38, %v1939_v46 }
 0x3e6   : > { %2068 = vst [vmem:[%s3959_s14 + $0x28] sm:$0xff] %v2881_v1  ;;  %2886 = vtanh.f32 %v1948_v52 }
 0x3e7   : > { %2888 = vtanh.f32 %v1940_v10 }
 0x3ee   : > { %v2883_v9 = vpop.eup %2882 }
 0x3ef   : > { %v2885_v12 = vpop.eup %2884  ;;  %2073 = vst [vmem:[%s3959_s14 + $0x50] sm:$0xff] %v2883_v9 }
 0x3f0   : > { %v2887_v63 = vpop.eup %2886  ;;  %2071 = vst [vmem:[%s3959_s14 + $0x40] sm:$0xff] %v2885_v12 }
 0x3f1   : > { %v2889_v62 = vpop.eup %2888  ;;  %2074 = vst [vmem:[%s3959_s14 + $0x58] sm:$0xff] %v2887_v63 }
 0x3f2   : > { %2072 = vst [vmem:[%s3959_s14 + $0x48] sm:$0xff] %v2889_v62 }
 0x3f3   : > { %v2574_v23 = vpop.f32.mrb[40].mxu1 }
 0x3f4   : > { %v1961_v50 = vadd.f32 %v2574_v23, %v3947_v38  ;;  %v1952_v31 = vpop.f32.mrb[41].mxu1 }
 0x3f5   : > { %v1953_v8 = vadd.f32 %v3947_v38, %v1952_v31  ;;  %v2575_v54 = vpop.f32.mrb[42].mxu1 }
 0x3f6   : > { %2890 = vtanh.f32 %v1961_v50  ;;  %v1964_v41 = vadd.f32 %v2575_v54, %v3947_v38  ;;  %v1955_v45 = vpop.f32.mrb[43].mxu1 }
 0x3f7   : > { %2892 = vtanh.f32 %v1953_v8  ;;  %v1956_v22 = vadd.f32 %v3947_v38, %v1955_v45 }
 0x3f8   : > { %2894 = vtanh.f32 %v1964_v41 }
 0x3f9   : > { %2896 = vtanh.f32 %v1956_v22 }
 0x3fb   : > { %v2578_v20 = vpop.f32.mrb[44].mxu1 }
 0x3fc   : > { %v1977_v13 = vadd.f32 %v2578_v20, %v3947_v38  ;;  %v1968_v42 = vpop.f32.mrb[45].mxu1 }
 0x3fd   : > { %v1969_v5 = vadd.f32 %v3947_v38, %v1968_v42  ;;  %v2579_v26 = vpop.f32.mrb[46].mxu1 }
 0x3fe   : > { %2898 = vtanh.f32 %v1977_v13  ;;  %v1980_v17 = vadd.f32 %v2579_v26, %v3947_v38  ;;  %v1971_v60 = vpop.f32.mrb[47].mxu1 }
 0x3ff   : > { %2900 = vtanh.f32 %v1969_v5  ;;  %v1972_v25 = vadd.f32 %v3947_v38, %v1971_v60 }
 0x400   : > { %v2891_v11 = vpop.eup %2890  ;;  %2902 = vtanh.f32 %v1980_v17 }
 0x401   : > { %v2893_v47 = vpop.eup %2892  ;;  %2077 = vst [vmem:[%s3959_s14 + $0x70] sm:$0xff] %v2891_v11  ;;  %2904 = vtanh.f32 %v1972_v25 }
 0x402   : > { %v2895_v16 = vpop.eup %2894  ;;  %2075 = vst [vmem:[%s3959_s14 + $0x60] sm:$0xff] %v2893_v47 }
 0x403   : > { %v2897_v33 = vpop.eup %2896  ;;  %2078 = vst [vmem:[%s3959_s14 + $0x78] sm:$0xff] %v2895_v16  ;;  %v2582_v32 = vpop.f32.mrb[48].mxu1 }
 0x404   : > { %2076 = vst [vmem:[%s3959_s14 + $0x68] sm:$0xff] %v2897_v33  ;;  %v1993_v53 = vadd.f32 %v2582_v32, %v3947_v38  ;;  %v1984_v18 = vpop.f32.mrb[49].mxu1 }
 0x405   : > { %v1985_v19 = vadd.f32 %v3947_v38, %v1984_v18  ;;  %v2583_v36 = vpop.f32.mrb[50].mxu1 }
 0x406   : > { %2906 = vtanh.f32 %v1993_v53  ;;  %v1996_v28 = vadd.f32 %v2583_v36, %v3947_v38  ;;  %v1987_v37 = vpop.f32.mrb[51].mxu1 }
 0x407   : > { %2908 = vtanh.f32 %v1985_v19  ;;  %v1988_v40 = vadd.f32 %v3947_v38, %v1987_v37 }
 0x408   : > { %v2899_v49 = vpop.eup %2898  ;;  %2910 = vtanh.f32 %v1996_v28 }
 0x409   : > { %v2901_v43 = vpop.eup %2900  ;;  %2081 = vst [vmem:[%s3959_s14 + $0x90] sm:$0xff] %v2899_v49  ;;  %2912 = vtanh.f32 %v1988_v40 }
 0x40a   : > { %v2903_v2 = vpop.eup %2902  ;;  %2079 = vst [vmem:[%s3959_s14 + $0x80] sm:$0xff] %v2901_v43 }
 0x40b   : > { %v2905_v56 = vpop.eup %2904  ;;  %2082 = vst [vmem:[%s3959_s14 + $0x98] sm:$0xff] %v2903_v2  ;;  %v2586_v24 = vpop.f32.mrb[52].mxu1 }
 0x40c   : > { %2080 = vst [vmem:[%s3959_s14 + $0x88] sm:$0xff] %v2905_v56  ;;  %v2009_v6 = vadd.f32 %v2586_v24, %v3947_v38  ;;  %v2000_v0 = vpop.f32.mrb[53].mxu1 }
 0x40d   : > { %v2001_v48 = vadd.f32 %v3947_v38, %v2000_v0  ;;  %v2587_v44 = vpop.f32.mrb[54].mxu1 }
 0x40e   : > { %2914 = vtanh.f32 %v2009_v6  ;;  %v2012_v51 = vadd.f32 %v2587_v44, %v3947_v38  ;;  %v2003_v55 = vpop.f32.mrb[55].mxu1 }
 0x40f   : > { %2916 = vtanh.f32 %v2001_v48  ;;  %v2004_v21 = vadd.f32 %v3947_v38, %v2003_v55 }
 0x410   : > { %v2907_v57 = vpop.eup %2906  ;;  %2918 = vtanh.f32 %v2012_v51 }
 0x411   : > { %v2909_v7 = vpop.eup %2908  ;;  %2085 = vst [vmem:[%s3959_s14 + $0xb0] sm:$0xff] %v2907_v57  ;;  %2920 = vtanh.f32 %v2004_v21 }
 0x412   : > { %v2911_v58 = vpop.eup %2910  ;;  %2083 = vst [vmem:[%s3959_s14 + $0xa0] sm:$0xff] %v2909_v7 }
 0x413   : > { %v2913_v15 = vpop.eup %2912  ;;  %2086 = vst [vmem:[%s3959_s14 + $0xb8] sm:$0xff] %v2911_v58  ;;  %v2590_v4 = vpop.f32.mrb[56].mxu1 }
 0x414   : > { %2084 = vst [vmem:[%s3959_s14 + $0xa8] sm:$0xff] %v2913_v15  ;;  %v2025_v59 = vadd.f32 %v2590_v4, %v3947_v38  ;;  %v2016_v14 = vpop.f32.mrb[57].mxu1 }
 0x415   : > { %v2017_v27 = vadd.f32 %v3947_v38, %v2016_v14  ;;  %v2591_v35 = vpop.f32.mrb[58].mxu1 }
 0x416   : > { %2922 = vtanh.f32 %v2025_v59  ;;  %v2028_v61 = vadd.f32 %v2591_v35, %v3947_v38  ;;  %v2019_v1 = vpop.f32.mrb[59].mxu1 }
 0x417   : > { %2924 = vtanh.f32 %v2017_v27  ;;  %v2020_v3 = vadd.f32 %v3947_v38, %v2019_v1 }
 0x418   : > { %v2915_v30 = vpop.eup %2914  ;;  %2926 = vtanh.f32 %v2028_v61 }
 0x419   : > { %v2917_v29 = vpop.eup %2916  ;;  %2089 = vst [vmem:[%s3959_s14 + $0xd0] sm:$0xff] %v2915_v30  ;;  %2928 = vtanh.f32 %v2020_v3 }
 0x41a   : > { %v2919_v39 = vpop.eup %2918  ;;  %2087 = vst [vmem:[%s3959_s14 + $0xc0] sm:$0xff] %v2917_v29 }
 0x41b   : > { %v2921_v34 = vpop.eup %2920  ;;  %2090 = vst [vmem:[%s3959_s14 + $0xd8] sm:$0xff] %v2919_v39 }
 0x41c   : > { %2088 = vst [vmem:[%s3959_s14 + $0xc8] sm:$0xff] %v2921_v34 }
 0x420   : > { %v2923_v52 = vpop.eup %2922 }
 0x421   : > { %v2925_v46 = vpop.eup %2924  ;;  %2093 = vst [vmem:[%s3959_s14 + $0xf0] sm:$0xff] %v2923_v52 }
 0x422   : > { %v2927_v38 = vpop.eup %2926  ;;  %2091 = vst [vmem:[%s3959_s14 + $0xe0] sm:$0xff] %v2925_v46 }
 0x423   : > { %v2929_v10 = vpop.eup %2928  ;;  %2094 = vst [vmem:[%s3959_s14 + $0xf8] sm:$0xff] %v2927_v38 }
 0x424   : > { %2092 = vst [vmem:[%s3959_s14 + $0xe8] sm:$0xff] %v2929_v10 }
 0x425   : > { %2943 = shalt.err (!%p2940_p3)
}
 0x426   : > { %s2944_s9 = scalar_lea.hbm %s4020_s19, 4096  ;;  %s2948_s12 = scalar_lea.hbm %s4076_s6, 8192 }
 0x427   : > { %p2945_p4 = scmp.ne.s32.totalorder %s4020_s19, %s2944_s9  ;;  %p2949_p9 = scmp.lt.u32.totalorder %s4020_s19, %s4076_s6 }
 0x428   : > { %p2950_p10 = scmp.lt.u32.totalorder %s2948_s12, %s2944_s9  ;;  %p2952_p12 = scmp.lt.u32.totalorder %s2944_s9, %s4020_s19 }
 0x429   : > { %p2946_p7 = pnand %p2945_p4, %p3070_p5 }
 0x42a   : > { %p2951_p11 = por %p2950_p10, %p2949_p9 }
 0x42b   : > { %p2947_p8 = pneg %p2946_p7 }
 0x42c   : > { %p2953_p13 = por %p2952_p12, %p2951_p11 }
 0x42e   : > { %p2954_p0 = pnand %p2953_p13, %p2947_p8 }
 0x430   : > { %2957 = shalt.err (!%p2954_p0)
}
 0x431   : > { %s2995_s15 = smov 128   ;;  %s2996_s17 = smov 8  }
 0x432   : > { %2608 = dma.vmem_to_hbm [thread:$0]  (%p3070_p5), %s4022_s16, 4096, %s4020_s19, %s4029_s25, %s2995_s15, %s2995_s15, %s2996_s17  }
 0x433 PF: > { %p2614_p1 = scmp.ge.s32.totalorder %s2992_s24, 2  ;;  %s2124_s18 = sand.u32 1, %s2980_s21  }
 0x434   : > { %s2125_s20 = scalar_lea.sflag [#allocation3], %s2124_s18 }
 0x435   : > { %p2611_p2 = pnand %p2614_p1, %p3074_p6 }
 0x437   : > { %2975 = dma.done.wait (!%p2611_p2), %s2125_s20, 4096  }
 0x438   : > { %2977 = vsyncadd (!%p2611_p2), %s2125_s20, 4294963200  ;;  %p16_p3 = scmp.ge.s32.totalorder %s3057_s27, 4   ;;  %s4079_s21 = smov %s2984_s22 }
 0x439   : > { %s4080_s22 = smov %s2988_s23  ;;  %s4081_s23 = smov %s3068_s30 }
 0x43a   : > { %s4082_s24 = smov %s3057_s27  ;;  %18 = sbr.rel (!%p16_p3) target bundleno = 3 (0x3), region = 79 }
 0x441   :  { %2130 = vsyncpa [#allocation3], 1 }
 0x442   :  { %2132 = vsyncpa [#allocation3 + $0x1], 1 }

</bundles_post_ra>
